<compile_context>
chip_gen: v6e
topology: v6e:2x2x1
jax: 0.10.0
libtpu: 0.0.40
codegen_flags: <defaults>
</compile_context>

<pallas_src>
import functools

import jax
import jax.numpy as jnp
from jax.experimental import pallas as pl
from jax.experimental.pallas import tpu as pltpu

EPS = 1e-5                      # PyTorch BatchNorm2d default
MATMUL_DTYPE = jnp.float32      # set to jnp.bfloat16 for 2x MXU rate (~1e-2 rel. error)


def cnn_block_kernel(x_ref, wt_ref, g1_ref, b1_ref, g2_ref, b2_ref,
                     cg_in_ref, ce_in_ref, cg_out_ref, ce_out_ref,
                     o_ref, pad_ref, *, stride, padding):
    """x_ref: (N*H, W*Cin); wt_ref: (kH, W*Cin, Wout*Cout); o_ref: (N*Hout, Wout*Cout)."""
    NH, WC = x_ref.shape
    N, Hrows, _ = pad_ref.shape            # Hrows = H + 2*padding
    H = NH // N
    kH = wt_ref.shape[0]
    Cin = cg_in_ref.shape[1]
    Cout = cg_out_ref.shape[1]
    W = WC // Cin
    NHo, WCo = o_ref.shape
    Hout = NHo // N
    Wout = WCo // Cout

    x = x_ref[...].astype(jnp.float32)

    # ---- BatchNorm2d #1: single-pass batch stats (biased var), lane-dense apply ----
    inv_cnt1 = 1.0 / float(N * H * W)
    mean1 = jnp.dot(jnp.sum(x, axis=0, keepdims=True), cg_in_ref[...],
                    preferred_element_type=jnp.float32) * inv_cnt1          # (1, Cin)
    ex2_1 = jnp.dot(jnp.sum(x * x, axis=0, keepdims=True), cg_in_ref[...],
                    preferred_element_type=jnp.float32) * inv_cnt1          # (1, Cin)
    var1 = ex2_1 - mean1 * mean1
    scale1 = g1_ref[...] * jax.lax.rsqrt(var1 + EPS)                        # (1, Cin)
    shift1 = b1_ref[...] - mean1 * scale1                                   # (1, Cin)
    # per-channel -> per-lane broadcast via tiny matmul (keeps the apply lane-dense)
    scale1_l = jnp.dot(scale1, ce_in_ref[...], preferred_element_type=jnp.float32)
    shift1_l = jnp.dot(shift1, ce_in_ref[...], preferred_element_type=jnp.float32)
    z = x * scale1_l + shift1_l                                             # (N*H, W*Cin)

    # ---- row-padded copy of z: zero ONLY the 2*N*padding halo rows ----
    if padding > 0:
        pad_ref[:, :padding, :] = jnp.zeros((N, padding, WC), jnp.float32)
        pad_ref[:, H + padding:, :] = jnp.zeros((N, Hrows - H - padding, WC),
                                                jnp.float32)
    pad_ref[:, padding:padding + H, :] = z.reshape(N, H, WC)
    padded = pad_ref[...]                                                   # (N, Hrows, W*Cin)

    # ---- Conv2d: kH accumulated lane-dense MXU matmuls vs. block-Toeplitz weights
    # (kw taps and W-direction zero padding are folded into wt, see wrapper).
    acc = jnp.zeros((NHo, WCo), jnp.float32)
    for kh in range(kH):                                                    # static unroll
        # TODO(synk): for stride > 1 this is a strided second-minor slice (relayout);
        # prefer a contiguous slice + reshape-subsample there.
        zr = padded[:, kh:kh + stride * (Hout - 1) + 1:stride, :]           # (N, Hout, W*Cin)
        zr = zr.reshape(NHo, WC).astype(MATMUL_DTYPE)
        acc = acc + jnp.dot(zr, wt_ref[kh].astype(MATMUL_DTYPE),
                            preferred_element_type=jnp.float32)

    # ---- BatchNorm2d #2 (single-pass stats) + ReLU, lane-dense (32x128) store ----
    inv_cnt2 = 1.0 / float(N * Hout * Wout)
    mean2 = jnp.dot(jnp.sum(acc, axis=0, keepdims=True), cg_out_ref[...],
                    preferred_element_type=jnp.float32) * inv_cnt2          # (1, Cout)
    ex2_2 = jnp.dot(jnp.sum(acc * acc, axis=0, keepdims=True), cg_out_ref[...],
                    preferred_element_type=jnp.float32) * inv_cnt2
    var2 = ex2_2 - mean2 * mean2
    scale2 = g2_ref[...] * jax.lax.rsqrt(var2 + EPS)
    shift2 = b2_ref[...] - mean2 * scale2
    scale2_l = jnp.dot(scale2, ce_out_ref[...], preferred_element_type=jnp.float32)
    shift2_l = jnp.dot(shift2, ce_out_ref[...], preferred_element_type=jnp.float32)
    y = acc * scale2_l + shift2_l                                           # (N*Hout, Wout*Cout)
    o_ref[...] = jnp.maximum(y, 0.0).astype(o_ref.dtype)


def _lowered_conv_weights(w_oihw, W, Wout, *, stride, padding):
    """Repack OIHW conv weights into kH block-Toeplitz matrices of shape
    (W*Cin, Wout*Cout).  kw taps and W-direction zero padding are folded in, so
    the kernel's conv is plain lane-dense matmuls."""
    Cout, Cin, kH, kW = w_oihw.shape
    w_hwio = jnp.transpose(w_oihw, (2, 3, 1, 0)).astype(jnp.float32)  # (kH,kW,Cin,Cout)
    c_idx = jnp.arange(W)[:, None]          # input column index
    j_idx = jnp.arange(Wout)[None, :]       # output column index
    mats = []
    for kh in range(kH):
        m = jnp.zeros((W, Cin, Wout, Cout), jnp.float32)
        for kw in range(kW):
            sel = (c_idx == j_idx * stride + kw - padding).astype(jnp.float32)  # (W, Wout)
            m = m + sel[:, None, :, None] * w_hwio[kh, kw][None, :, None, :]
        mats.append(m.reshape(W * Cin, Wout * Cout))
    return jnp.stack(mats, axis=0)          # (kH, W*Cin, Wout*Cout)


@functools.partial(jax.jit, static_argnames=("stride", "padding", "groups"))
def cnn_block_nhwc(x_nhwc, conv_w_oihw, gamma1, beta1, gamma2, beta2,
                   *, stride, padding, groups=1):
    """NHWC-in / NHWC-out CNNBlock forward (no layout transposes at all)."""
    assert groups == 1  # TODO(synk): grouped conv (groups > 1) not implemented
    N, H, W, Cin = x_nhwc.shape
    Cout, _, kH, kW = conv_w_oihw.shape
    Hout = (H + 2 * padding - kH) // stride + 1
    Wout = (W + 2 * padding - kW) // stride + 1

    wt = _lowered_conv_weights(conv_w_oihw, W, Wout, stride=stride, padding=padding)

    # channel-gather (lane -> channel) and channel-expand (channel -> lane) matrices
    cg_in = jnp.tile(jnp.eye(Cin, dtype=jnp.float32), (W, 1))         # (W*Cin,  Cin)
    cg_out = jnp.tile(jnp.eye(Cout, dtype=jnp.float32), (Wout, 1))    # (Wout*Cout, Cout)

    x2 = x_nhwc.reshape(N * H, W * Cin).astype(jnp.float32)           # lane-dense input
    g1 = gamma1.reshape(1, Cin).astype(jnp.float32)
    b1 = beta1.reshape(1, Cin).astype(jnp.float32)
    g2 = gamma2.reshape(1, Cout).astype(jnp.float32)
    b2 = beta2.reshape(1, Cout).astype(jnp.float32)

    kernel = functools.partial(cnn_block_kernel, stride=stride, padding=padding)
    out2 = pl.pallas_call(
        kernel,
        out_shape=jax.ShapeDtypeStruct((N * Hout, Wout * Cout), jnp.float32),
        in_specs=[pl.BlockSpec(memory_space=pltpu.MemorySpace.VMEM)] * 10,
        out_specs=pl.BlockSpec(memory_space=pltpu.MemorySpace.VMEM),
        scratch_shapes=[
            pltpu.VMEM((N, H + 2 * padding, W * Cin), jnp.float32),   # row-padded z
        ],
        compiler_params=pltpu.CompilerParams(vmem_limit_bytes=32 * 1024 * 1024),
    )(x2, wt, g1, b1, g2, b2, cg_in, cg_in.T, cg_out, cg_out.T)
    return out2.reshape(N, Hout, Wout, Cout)


@functools.partial(jax.jit, static_argnames=("stride", "padding", "groups"))
def cnn_block(x_nchw, conv_w_oihw, gamma1, beta1, gamma2, beta2,
              *, stride, padding, groups=1):
    """NCHW-in / NCHW-out wrapper matching the PyTorch module's contract.
    The two transposes exist only because of that contract; channels-last
    callers should use cnn_block_nhwc directly and they disappear."""
    x_nhwc = jnp.transpose(x_nchw, (0, 2, 3, 1))
    out_nhwc = cnn_block_nhwc(x_nhwc, conv_w_oihw, gamma1, beta1, gamma2, beta2,
                              stride=stride, padding=padding, groups=groups)
    return jnp.transpose(out_nhwc, (0, 3, 1, 2))


def cnn_block_reference(x, w, g1, b1, g2, b2, *, stride, padding):
    """Pure-JAX reference (NCHW throughout) for correctness checking."""
    x = x.astype(jnp.float32)
    m1 = x.mean(axis=(0, 2, 3), keepdims=True)
    v1 = ((x - m1) ** 2).mean(axis=(0, 2, 3), keepdims=True)
    z = (x - m1) / jnp.sqrt(v1 + EPS) * g1.reshape(1, -1, 1, 1) \
        + b1.reshape(1, -1, 1, 1)
    y = jax.lax.conv_general_dilated(
        z, w.astype(jnp.float32), (stride, stride),
        [(padding, padding), (padding, padding)],
        dimension_numbers=('NCHW', 'OIHW', 'NCHW'))
    m2 = y.mean(axis=(0, 2, 3), keepdims=True)
    v2 = ((y - m2) ** 2).mean(axis=(0, 2, 3), keepdims=True)
    y = (y - m2) / jnp.sqrt(v2 + EPS) * g2.reshape(1, -1, 1, 1) \
        + b2.reshape(1, -1, 1, 1)
    return jnp.maximum(y, 0.0)


if __name__ == "__main__":
    # CNNBlock(in_channels=4, out_channels=8, kernel_size=3, stride=1, padding=1)
    N, Cin, H, W = 2, 4, 16, 16
    Cout, K, stride, padding = 8, 3, 1, 1

    key = jax.random.PRNGKey(0)
    kx, kw, kg1, kb1, kg2, kb2 = jax.random.split(key, 6)
    x = jax.random.normal(kx, (N, Cin, H, W), jnp.float32)
    conv_w = jax.random.normal(kw, (Cout, Cin, K, K), jnp.float32) * 0.1
    gamma1 = 1.0 + 0.1 * jax.random.normal(kg1, (Cin,), jnp.float32)
    beta1 = 0.1 * jax.random.normal(kb1, (Cin,), jnp.float32)
    gamma2 = 1.0 + 0.1 * jax.random.normal(kg2, (Cout,), jnp.float32)
    beta2 = 0.1 * jax.random.normal(kb2, (Cout,), jnp.float32)

    out = cnn_block(x, conv_w, gamma1, beta1, gamma2, beta2,
                    stride=stride, padding=padding)
    out = jax.block_until_ready(out)

    ref = cnn_block_reference(x, conv_w, gamma1, beta1, gamma2, beta2,
                              stride=stride, padding=padding)
    ref = jax.block_until_ready(ref)

    assert out.shape == (N, Cout, H, W), out.shape
    assert jnp.allclose(out, ref, atol=2e-4, rtol=2e-4), \
        float(jnp.max(jnp.abs(out - ref)))
    print("KERNEL_OK")
</pallas_src>

<mosaic_0001>
module attributes {stable_mosaic.version = 11 : i64} {
  func.func @cnn_block_kernel(%arg0: memref<32x64xf32, #tpu.memory_space<vmem>>, %arg1: memref<3x64x128xf32, #tpu.memory_space<vmem>>, %arg2: memref<1x4xf32, #tpu.memory_space<vmem>>, %arg3: memref<1x4xf32, #tpu.memory_space<vmem>>, %arg4: memref<1x8xf32, #tpu.memory_space<vmem>>, %arg5: memref<1x8xf32, #tpu.memory_space<vmem>>, %arg6: memref<64x4xf32, #tpu.memory_space<vmem>>, %arg7: memref<4x64xf32, #tpu.memory_space<vmem>>, %arg8: memref<128x8xf32, #tpu.memory_space<vmem>>, %arg9: memref<8x128xf32, #tpu.memory_space<vmem>>, %arg10: memref<32x128xf32, #tpu.memory_space<vmem>>, %arg11: memref<2x18x64xf32, #tpu.memory_space<vmem>>) attributes {dimension_semantics = [], scalar_prefetch = 0 : i64, scratch_operands = 1 : i64, tpu.core_type = #tpu.core_type<tc>} {
    %c0 = arith.constant 0 : index
    %c0_0 = arith.constant 0 : index
    %0 = vector.load %arg0[%c0, %c0_0] : memref<32x64xf32, #tpu.memory_space<vmem>>, vector<32x64xf32>
    %cst = arith.constant dense<0.000000e+00> : vector<64xf32>
    %1 = vector.multi_reduction <add>, %0, %cst [0] : vector<32x64xf32> to vector<64xf32>
    %2 = vector.shape_cast %1 : vector<64xf32> to vector<1x64xf32>
    %c0_1 = arith.constant 0 : index
    %c0_2 = arith.constant 0 : index
    %3 = vector.load %arg6[%c0_1, %c0_2] : memref<64x4xf32, #tpu.memory_space<vmem>>, vector<64x4xf32>
    %cst_3 = arith.constant dense<0.000000e+00> : vector<1x4xf32>
    %4 = tpu.matmul %2, %3, %cst_3 {dimension_numbers = #tpu.dot_dimension_numbers<[1], [0], [0], [1], [0, 0, 1, 1], [], []>} : vector<1x64xf32>, vector<64x4xf32>, vector<1x4xf32> -> vector<1x4xf32>
    %cst_4 = arith.constant 0.001953125 : f32
    %5 = vector.broadcast %cst_4 : f32 to vector<1x4xf32>
    %6 = arith.mulf %4, %5 : vector<1x4xf32>
    %7 = arith.mulf %0, %0 : vector<32x64xf32>
    %cst_5 = arith.constant dense<0.000000e+00> : vector<64xf32>
    %8 = vector.multi_reduction <add>, %7, %cst_5 [0] : vector<32x64xf32> to vector<64xf32>
    %9 = vector.shape_cast %8 : vector<64xf32> to vector<1x64xf32>
    %c0_6 = arith.constant 0 : index
    %c0_7 = arith.constant 0 : index
    %10 = vector.load %arg6[%c0_6, %c0_7] : memref<64x4xf32, #tpu.memory_space<vmem>>, vector<64x4xf32>
    %cst_8 = arith.constant dense<0.000000e+00> : vector<1x4xf32>
    %11 = tpu.matmul %9, %10, %cst_8 {dimension_numbers = #tpu.dot_dimension_numbers<[1], [0], [0], [1], [0, 0, 1, 1], [], []>} : vector<1x64xf32>, vector<64x4xf32>, vector<1x4xf32> -> vector<1x4xf32>
    %cst_9 = arith.constant 0.001953125 : f32
    %12 = vector.broadcast %cst_9 : f32 to vector<1x4xf32>
    %13 = arith.mulf %11, %12 : vector<1x4xf32>
    %14 = arith.mulf %6, %6 : vector<1x4xf32>
    %15 = arith.subf %13, %14 : vector<1x4xf32>
    %c0_10 = arith.constant 0 : index
    %c0_11 = arith.constant 0 : index
    %16 = vector.load %arg2[%c0_10, %c0_11] : memref<1x4xf32, #tpu.memory_space<vmem>>, vector<1x4xf32>
    %cst_12 = arith.constant 9.99999974E-6 : f32
    %17 = vector.broadcast %cst_12 : f32 to vector<1x4xf32>
    %18 = arith.addf %15, %17 : vector<1x4xf32>
    %19 = math.rsqrt %18 : vector<1x4xf32>
    %20 = arith.mulf %16, %19 : vector<1x4xf32>
    %c0_13 = arith.constant 0 : index
    %c0_14 = arith.constant 0 : index
    %21 = vector.load %arg3[%c0_13, %c0_14] : memref<1x4xf32, #tpu.memory_space<vmem>>, vector<1x4xf32>
    %22 = arith.mulf %6, %20 : vector<1x4xf32>
    %23 = arith.subf %21, %22 : vector<1x4xf32>
    %c0_15 = arith.constant 0 : index
    %c0_16 = arith.constant 0 : index
    %24 = vector.load %arg7[%c0_15, %c0_16] : memref<4x64xf32, #tpu.memory_space<vmem>>, vector<4x64xf32>
    %cst_17 = arith.constant dense<0.000000e+00> : vector<1x64xf32>
    %25 = tpu.matmul %20, %24, %cst_17 {dimension_numbers = #tpu.dot_dimension_numbers<[1], [0], [0], [1], [0, 0, 1, 1], [], []>} : vector<1x4xf32>, vector<4x64xf32>, vector<1x64xf32> -> vector<1x64xf32>
    %c0_18 = arith.constant 0 : index
    %c0_19 = arith.constant 0 : index
    %26 = vector.load %arg7[%c0_18, %c0_19] : memref<4x64xf32, #tpu.memory_space<vmem>>, vector<4x64xf32>
    %cst_20 = arith.constant dense<0.000000e+00> : vector<1x64xf32>
    %27 = tpu.matmul %23, %26, %cst_20 {dimension_numbers = #tpu.dot_dimension_numbers<[1], [0], [0], [1], [0, 0, 1, 1], [], []>} : vector<1x4xf32>, vector<4x64xf32>, vector<1x64xf32> -> vector<1x64xf32>
    %28 = vector.broadcast %25 : vector<1x64xf32> to vector<32x64xf32>
    %29 = arith.mulf %0, %28 : vector<32x64xf32>
    %30 = vector.broadcast %27 : vector<1x64xf32> to vector<32x64xf32>
    %31 = arith.addf %29, %30 : vector<32x64xf32>
    %cst_21 = arith.constant 0.000000e+00 : f32
    %32 = vector.broadcast %cst_21 : f32 to vector<2x1x64xf32>
    %c0_22 = arith.constant 0 : index
    %c0_23 = arith.constant 0 : index
    %c0_24 = arith.constant 0 : index
    %33 = vector.load %arg11[%c0_22, %c0_23, %c0_24] : memref<2x18x64xf32, #tpu.memory_space<vmem>>, vector<2x1x64xf32>
    tpu.vector_store %arg11[%c0_22, %c0_23, %c0_24], %32 {strides = array<i32>} : memref<2x18x64xf32, #tpu.memory_space<vmem>>, vector<2x1x64xf32>,
    %cst_25 = arith.constant 0.000000e+00 : f32
    %34 = vector.broadcast %cst_25 : f32 to vector<2x1x64xf32>
    %c0_26 = arith.constant 0 : index
    %c17 = arith.constant 17 : index
    %c0_27 = arith.constant 0 : index
    %35 = vector.load %arg11[%c0_26, %c17, %c0_27] : memref<2x18x64xf32, #tpu.memory_space<vmem>>, vector<2x1x64xf32>
    tpu.vector_store %arg11[%c0_26, %c17, %c0_27], %34 {strides = array<i32>} : memref<2x18x64xf32, #tpu.memory_space<vmem>>, vector<2x1x64xf32>,
    %36 = vector.shape_cast %31 : vector<32x64xf32> to vector<2x16x64xf32>
    %c0_28 = arith.constant 0 : index
    %c1 = arith.constant 1 : index
    %c0_29 = arith.constant 0 : index
    %37 = vector.load %arg11[%c0_28, %c1, %c0_29] : memref<2x18x64xf32, #tpu.memory_space<vmem>>, vector<2x16x64xf32>
    tpu.vector_store %arg11[%c0_28, %c1, %c0_29], %36 {strides = array<i32>} : memref<2x18x64xf32, #tpu.memory_space<vmem>>, vector<2x16x64xf32>,
    %c0_30 = arith.constant 0 : index
    %c0_31 = arith.constant 0 : index
    %c0_32 = arith.constant 0 : index
    %38 = vector.load %arg11[%c0_30, %c0_31, %c0_32] : memref<2x18x64xf32, #tpu.memory_space<vmem>>, vector<2x18x64xf32>
    %cst_33 = arith.constant 0.000000e+00 : f32
    %39 = vector.broadcast %cst_33 : f32 to vector<32x128xf32>
    %40 = vector.extract_strided_slice %38 {offsets = [0, 0, 0], sizes = [2, 16, 64], strides = [1, 1, 1]} : vector<2x18x64xf32> to vector<2x16x64xf32>
    %41 = vector.shape_cast %40 : vector<2x16x64xf32> to vector<32x64xf32>
    %c0_34 = arith.constant 0 : index
    %c0_35 = arith.constant 0 : index
    %c0_36 = arith.constant 0 : index
    %42 = vector.load %arg1[%c0_34, %c0_35, %c0_36] : memref<3x64x128xf32, #tpu.memory_space<vmem>>, vector<1x64x128xf32>
    %43 = vector.shape_cast %42 : vector<1x64x128xf32> to vector<64x128xf32>
    %cst_37 = arith.constant dense<0.000000e+00> : vector<32x128xf32>
    %44 = tpu.matmul %41, %43, %cst_37 {dimension_numbers = #tpu.dot_dimension_numbers<[1], [0], [0], [1], [0, 0, 1, 1], [], []>} : vector<32x64xf32>, vector<64x128xf32>, vector<32x128xf32> -> vector<32x128xf32>
    %45 = arith.addf %39, %44 : vector<32x128xf32>
    %46 = vector.extract_strided_slice %38 {offsets = [0, 1, 0], sizes = [2, 16, 64], strides = [1, 1, 1]} : vector<2x18x64xf32> to vector<2x16x64xf32>
    %47 = vector.shape_cast %46 : vector<2x16x64xf32> to vector<32x64xf32>
    %c1_38 = arith.constant 1 : index
    %c0_39 = arith.constant 0 : index
    %c0_40 = arith.constant 0 : index
    %48 = vector.load %arg1[%c1_38, %c0_39, %c0_40] : memref<3x64x128xf32, #tpu.memory_space<vmem>>, vector<1x64x128xf32>
    %49 = vector.shape_cast %48 : vector<1x64x128xf32> to vector<64x128xf32>
    %cst_41 = arith.constant dense<0.000000e+00> : vector<32x128xf32>
    %50 = tpu.matmul %47, %49, %cst_41 {dimension_numbers = #tpu.dot_dimension_numbers<[1], [0], [0], [1], [0, 0, 1, 1], [], []>} : vector<32x64xf32>, vector<64x128xf32>, vector<32x128xf32> -> vector<32x128xf32>
    %51 = arith.addf %45, %50 : vector<32x128xf32>
    %52 = vector.extract_strided_slice %38 {offsets = [0, 2, 0], sizes = [2, 16, 64], strides = [1, 1, 1]} : vector<2x18x64xf32> to vector<2x16x64xf32>
    %53 = vector.shape_cast %52 : vector<2x16x64xf32> to vector<32x64xf32>
    %c2 = arith.constant 2 : index
    %c0_42 = arith.constant 0 : index
    %c0_43 = arith.constant 0 : index
    %54 = vector.load %arg1[%c2, %c0_42, %c0_43] : memref<3x64x128xf32, #tpu.memory_space<vmem>>, vector<1x64x128xf32>
    %55 = vector.shape_cast %54 : vector<1x64x128xf32> to vector<64x128xf32>
    %cst_44 = arith.constant dense<0.000000e+00> : vector<32x128xf32>
    %56 = tpu.matmul %53, %55, %cst_44 {dimension_numbers = #tpu.dot_dimension_numbers<[1], [0], [0], [1], [0, 0, 1, 1], [], []>} : vector<32x64xf32>, vector<64x128xf32>, vector<32x128xf32> -> vector<32x128xf32>
    %57 = arith.addf %51, %56 : vector<32x128xf32>
    %cst_45 = arith.constant dense<0.000000e+00> : vector<128xf32>
    %58 = vector.multi_reduction <add>, %57, %cst_45 [0] : vector<32x128xf32> to vector<128xf32>
    %59 = vector.shape_cast %58 : vector<128xf32> to vector<1x128xf32>
    %c0_46 = arith.constant 0 : index
    %c0_47 = arith.constant 0 : index
    %60 = vector.load %arg8[%c0_46, %c0_47] : memref<128x8xf32, #tpu.memory_space<vmem>>, vector<128x8xf32>
    %cst_48 = arith.constant dense<0.000000e+00> : vector<1x8xf32>
    %61 = tpu.matmul %59, %60, %cst_48 {dimension_numbers = #tpu.dot_dimension_numbers<[1], [0], [0], [1], [0, 0, 1, 1], [], []>} : vector<1x128xf32>, vector<128x8xf32>, vector<1x8xf32> -> vector<1x8xf32>
    %cst_49 = arith.constant 0.001953125 : f32
    %62 = vector.broadcast %cst_49 : f32 to vector<1x8xf32>
    %63 = arith.mulf %61, %62 : vector<1x8xf32>
    %64 = arith.mulf %57, %57 : vector<32x128xf32>
    %cst_50 = arith.constant dense<0.000000e+00> : vector<128xf32>
    %65 = vector.multi_reduction <add>, %64, %cst_50 [0] : vector<32x128xf32> to vector<128xf32>
    %66 = vector.shape_cast %65 : vector<128xf32> to vector<1x128xf32>
    %c0_51 = arith.constant 0 : index
    %c0_52 = arith.constant 0 : index
    %67 = vector.load %arg8[%c0_51, %c0_52] : memref<128x8xf32, #tpu.memory_space<vmem>>, vector<128x8xf32>
    %cst_53 = arith.constant dense<0.000000e+00> : vector<1x8xf32>
    %68 = tpu.matmul %66, %67, %cst_53 {dimension_numbers = #tpu.dot_dimension_numbers<[1], [0], [0], [1], [0, 0, 1, 1], [], []>} : vector<1x128xf32>, vector<128x8xf32>, vector<1x8xf32> -> vector<1x8xf32>
    %cst_54 = arith.constant 0.001953125 : f32
    %69 = vector.broadcast %cst_54 : f32 to vector<1x8xf32>
    %70 = arith.mulf %68, %69 : vector<1x8xf32>
    %71 = arith.mulf %63, %63 : vector<1x8xf32>
    %72 = arith.subf %70, %71 : vector<1x8xf32>
    %c0_55 = arith.constant 0 : index
    %c0_56 = arith.constant 0 : index
    %73 = vector.load %arg4[%c0_55, %c0_56] : memref<1x8xf32, #tpu.memory_space<vmem>>, vector<1x8xf32>
    %cst_57 = arith.constant 9.99999974E-6 : f32
    %74 = vector.broadcast %cst_57 : f32 to vector<1x8xf32>
    %75 = arith.addf %72, %74 : vector<1x8xf32>
    %76 = math.rsqrt %75 : vector<1x8xf32>
    %77 = arith.mulf %73, %76 : vector<1x8xf32>
    %c0_58 = arith.constant 0 : index
    %c0_59 = arith.constant 0 : index
    %78 = vector.load %arg5[%c0_58, %c0_59] : memref<1x8xf32, #tpu.memory_space<vmem>>, vector<1x8xf32>
    %79 = arith.mulf %63, %77 : vector<1x8xf32>
    %80 = arith.subf %78, %79 : vector<1x8xf32>
    %c0_60 = arith.constant 0 : index
    %c0_61 = arith.constant 0 : index
    %81 = vector.load %arg9[%c0_60, %c0_61] : memref<8x128xf32, #tpu.memory_space<vmem>>, vector<8x128xf32>
    %cst_62 = arith.constant dense<0.000000e+00> : vector<1x128xf32>
    %82 = tpu.matmul %77, %81, %cst_62 {dimension_numbers = #tpu.dot_dimension_numbers<[1], [0], [0], [1], [0, 0, 1, 1], [], []>} : vector<1x8xf32>, vector<8x128xf32>, vector<1x128xf32> -> vector<1x128xf32>
    %c0_63 = arith.constant 0 : index
    %c0_64 = arith.constant 0 : index
    %83 = vector.load %arg9[%c0_63, %c0_64] : memref<8x128xf32, #tpu.memory_space<vmem>>, vector<8x128xf32>
    %cst_65 = arith.constant dense<0.000000e+00> : vector<1x128xf32>
    %84 = tpu.matmul %80, %83, %cst_65 {dimension_numbers = #tpu.dot_dimension_numbers<[1], [0], [0], [1], [0, 0, 1, 1], [], []>} : vector<1x8xf32>, vector<8x128xf32>, vector<1x128xf32> -> vector<1x128xf32>
    %85 = vector.broadcast %82 : vector<1x128xf32> to vector<32x128xf32>
    %86 = arith.mulf %57, %85 : vector<32x128xf32>
    %87 = vector.broadcast %84 : vector<1x128xf32> to vector<32x128xf32>
    %88 = arith.addf %86, %87 : vector<32x128xf32>
    %cst_66 = arith.constant 0.000000e+00 : f32
    %89 = vector.broadcast %cst_66 : f32 to vector<32x128xf32>
    %90 = arith.maximumf %88, %89 : vector<32x128xf32>
    %c0_67 = arith.constant 0 : index
    %c0_68 = arith.constant 0 : index
    %91 = vector.load %arg10[%c0_67, %c0_68] : memref<32x128xf32, #tpu.memory_space<vmem>>, vector<32x128xf32>
    tpu.vector_store %arg10[%c0_67, %c0_68], %90 {strides = array<i32>} : memref<32x128xf32, #tpu.memory_space<vmem>>, vector<32x128xf32>,
    return
  }
}

</mosaic_0001>

<bundles_post_ra>
// kernel: tile.19
= control target key start
LH: loop header
LB: loop body
LE: loop exit
PB: predicated region body
PF: predicated region fallthrough
CT: control target
= control target key end

     0   :  { %vm6_vm0 = vcmask 1043458   ;;  %vm10_vm1 = vcmask 1045508   ;;  %vm14_vm2 = vcmask 1047558   ;;  %s19_s6 = smov 3  ;;  %s22_s7 = smov 12  ;;  %vm16_vm3 = vcmask 64512   ;;  %s736_s0 = inlined_call_operand.vmem [shape: f32[16,8,8], index: 0, kind: input, shape index: {}]   ;;  %s737_s1 = inlined_call_operand.vmem [shape: f32[128,8], index: 1, kind: output, shape index: {}]  }
   0x1   :  { %v348_v0 = vld [vmem:[%s736_s0 + $0xf] ss:$16 sm:%s19_s6]   ;;  %s27_s12 = smov 48  ;;  %s32_s13 = smov 192  ;;  %vm38_vm4 = vcmask 1048512   ;;  %vm60_vm5 = vcmask 982912  }
   0x2   :  { %v349_v1 = vld [vmem:[%s736_s0 + $0xf] ss:$16 sm:%s22_s7]   ;;  %s63_s18 = smov 3  ;;  %s66_s21 = smov 12  ;;  %vm82_vm6 = vcmask 917312   ;;  %vm104_vm7 = vcmask 851712  }
   0x3   :  { %v25_v2 = vsel %vm6_vm0, %v349_v1, %v348_v0  ;;  %v350_v3 = vld [vmem:[%s736_s0 + $0xf] ss:$16 sm:%s27_s12]   ;;  %v356_v6 = vld [vmem:[%s736_s0 + $0xd] ss:$16 sm:%s63_s18]   ;;  %s71_s22 = smov 48  ;;  %s76_s27 = smov 192 }
   0x4   :  { %v351_v4 = vld [vmem:[%s736_s0 + $0xf] ss:$16 sm:%s32_s13]   ;;  %v30_v5 = vsel %vm10_vm1, %v350_v3, %v25_v2  ;;  %v357_v8 = vld [vmem:[%s736_s0 + $0xd] ss:$16 sm:%s66_s21]   ;;  %s423_s28 = smov 120   ;;  %s41_s2 = smov 3 }
   0x5   :  { %v35_v7 = vsel %vm14_vm2, %v351_v4, %v30_v5  ;;  %v358_v9 = vld [vmem:[%s736_s0 + $0xd] ss:$16 sm:%s71_s22]   ;;  %v69_v10 = vsel %vm6_vm0, %v357_v8, %v356_v6  ;;  %s44_s3 = smov 12  ;;  %v352_v13 = vld [vmem:[%s736_s0 + $0xe] ss:$16 sm:%s41_s2]   ;;  %s49_s8 = smov 48 }
   0x6   :  { %36 = vrot.lane.b32.xlu0 %v35_v7, %s423_s28  ;;  %v359_v11 = vld [vmem:[%s736_s0 + $0xd] ss:$16 sm:%s76_s27]   ;;  %v74_v12 = vsel %vm10_vm1, %v358_v9, %v69_v10  ;;  %s54_s9 = smov 192  ;;  %s85_s14 = smov 3  ;;  %vm126_vm8 = vcmask 786112   ;;  %vm148_vm9 = vcmask 720512  }
   0x7   :  { %v353_v14 = vld [vmem:[%s736_s0 + $0xe] ss:$16 sm:%s44_s3]   ;;  %v79_v15 = vsel %vm14_vm2, %v359_v11, %v74_v12  ;;  %s424_s15 = smov 104   ;;  %v360_v20 = vld [vmem:[%s736_s0 + $0xc] ss:$16 sm:%s85_s14]   ;;  %s88_s18 = smov 12 }
   0x8   :  { %v47_v16 = vsel %vm6_vm0, %v353_v14, %v352_v13  ;;  %v354_v17 = vld [vmem:[%s736_s0 + $0xe] ss:$16 sm:%s49_s8]   ;;  %80 = vrot.lane.b32.xlu1 %v79_v15, %s424_s15  ;;  %s93_s19 = smov 48  ;;  %s98_s24 = smov 192  ;;  %vm170_vm10 = vcmask 654912   ;;  %vm192_vm11 = vcmask 589312  }
   0x9   :  { %v355_v18 = vld [vmem:[%s736_s0 + $0xe] ss:$16 sm:%s54_s9]   ;;  %v52_v19 = vsel %vm10_vm1, %v354_v17, %v47_v16  ;;  %v361_v22 = vld [vmem:[%s736_s0 + $0xc] ss:$16 sm:%s88_s18]   ;;  %s425_s25 = smov 112   ;;  %s107_s28 = smov 3 }
   0xa   :  { %v57_v21 = vsel %vm14_vm2, %v355_v18, %v52_v19  ;;  %v362_v23 = vld [vmem:[%s736_s0 + $0xc] ss:$16 sm:%s93_s19]   ;;  %v91_v24 = vsel %vm6_vm0, %v361_v22, %v360_v20  ;;  %s110_s29 = smov 12  ;;  %v364_v27 = vld [vmem:[%s736_s0 + $0xb] ss:$16 sm:%s107_s28]   ;;  %s115_s5 = smov 48 }
   0xb   :  { %58 = vrot.lane.b32.xlu0 %v57_v21, %s425_s25  ;;  %v363_v25 = vld [vmem:[%s736_s0 + $0xc] ss:$16 sm:%s98_s24]   ;;  %v96_v26 = vsel %vm10_vm1, %v362_v23, %v91_v24  ;;  %s120_s6 = smov 192  ;;  %s129_s11 = smov 3  ;;  %vm214_vm12 = vcmask 523712   ;;  %vm236_vm13 = vcmask 458112  }
   0xc   :  { %v365_v28 = vld [vmem:[%s736_s0 + $0xb] ss:$16 sm:%s110_s29]   ;;  %v101_v29 = vsel %vm14_vm2, %v363_v25, %v96_v26  ;;  %s426_s12 = smov 96   ;;  %v368_v34 = vld [vmem:[%s736_s0 + $0xa] ss:$16 sm:%s129_s11]   ;;  %s132_s15 = smov 12 }
   0xd   :  { %v113_v30 = vsel %vm6_vm0, %v365_v28, %v364_v27  ;;  %v366_v31 = vld [vmem:[%s736_s0 + $0xb] ss:$16 sm:%s115_s5]   ;;  %102 = vrot.lane.b32.xlu1 %v101_v29, %s426_s12  ;;  %s137_s16 = smov 48  ;;  %s142_s21 = smov 192  ;;  %vm258_vm14 = vcmask 392512   ;;  %vm280_vm15 = vcmask 326912  }
   0xe   :  { %v367_v32 = vld [vmem:[%s736_s0 + $0xb] ss:$16 sm:%s120_s6]   ;;  %v118_v33 = vsel %vm10_vm1, %v366_v31, %v113_v30  ;;  %v369_v36 = vld [vmem:[%s736_s0 + $0xa] ss:$16 sm:%s132_s15]   ;;  %s427_s22 = smov 88   ;;  %s151_s25 = smov 3 }
   0xf   :  { %v123_v35 = vsel %vm14_vm2, %v367_v32, %v118_v33  ;;  %v370_v37 = vld [vmem:[%s736_s0 + $0xa] ss:$16 sm:%s137_s16]   ;;  %v135_v38 = vsel %vm6_vm0, %v369_v36, %v368_v34  ;;  %s154_s26 = smov 12  ;;  %v372_v41 = vld [vmem:[%s736_s0 + $0x9] ss:$16 sm:%s151_s25]   ;;  %s159_s2 = smov 48 }
  0x10   :  { %124 = vrot.lane.b32.xlu0 %v123_v35, %s427_s22  ;;  %v371_v39 = vld [vmem:[%s736_s0 + $0xa] ss:$16 sm:%s142_s21]   ;;  %v140_v40 = vsel %vm10_vm1, %v370_v37, %v135_v38  ;;  %s164_s3 = smov 192  ;;  %s173_s8 = smov 3 }
  0x11   :  { %v373_v42 = vld [vmem:[%s736_s0 + $0x9] ss:$16 sm:%s154_s26]   ;;  %v145_v43 = vsel %vm14_vm2, %v371_v39, %v140_v40  ;;  %s428_s9 = smov 80   ;;  %v376_v48 = vld [vmem:[%s736_s0 + $0x8] ss:$16 sm:%s173_s8]   ;;  %s176_s12 = smov 12 }
  0x12   :  { %v157_v44 = vsel %vm6_vm0, %v373_v42, %v372_v41  ;;  %v374_v45 = vld [vmem:[%s736_s0 + $0x9] ss:$16 sm:%s159_s2]   ;;  %146 = vrot.lane.b32.xlu1 %v145_v43, %s428_s9  ;;  %s181_s13 = smov 48  ;;  %s186_s18 = smov 192 }
  0x13   :  { %v375_v46 = vld [vmem:[%s736_s0 + $0x9] ss:$16 sm:%s164_s3]   ;;  %v162_v47 = vsel %vm10_vm1, %v374_v45, %v157_v44  ;;  %v377_v50 = vld [vmem:[%s736_s0 + $0x8] ss:$16 sm:%s176_s12]   ;;  %s429_s19 = smov 72   ;;  %s195_s22 = smov 3 }
  0x14   :  { %v167_v49 = vsel %vm14_vm2, %v375_v46, %v162_v47  ;;  %v378_v51 = vld [vmem:[%s736_s0 + $0x8] ss:$16 sm:%s181_s13]   ;;  %v179_v52 = vsel %vm6_vm0, %v377_v50, %v376_v48  ;;  %s198_s23 = smov 12  ;;  %v380_v55 = vld [vmem:[%s736_s0 + $0x7] ss:$16 sm:%s195_s22]   ;;  %s203_s28 = smov 48 }
  0x15   :  { %168 = vrot.lane.b32.xlu0 %v167_v49, %s429_s19  ;;  %v379_v53 = vld [vmem:[%s736_s0 + $0x8] ss:$16 sm:%s186_s18]   ;;  %v184_v54 = vsel %vm10_vm1, %v378_v51, %v179_v52  ;;  %s208_s29 = smov 192  ;;  %s217_s5 = smov 3 }
  0x16   :  { %v381_v56 = vld [vmem:[%s736_s0 + $0x7] ss:$16 sm:%s198_s23]   ;;  %v189_v57 = vsel %vm14_vm2, %v379_v53, %v184_v54  ;;  %s430_s6 = smov 64   ;;  %v384_v62 = vld [vmem:[%s736_s0 + $0x6] ss:$16 sm:%s217_s5]   ;;  %s220_s9 = smov 12 }
  0x17   :  { %v201_v58 = vsel %vm6_vm0, %v381_v56, %v380_v55  ;;  %v382_v59 = vld [vmem:[%s736_s0 + $0x7] ss:$16 sm:%s203_s28]   ;;  %190 = vrot.lane.b32.xlu1 %v189_v57, %s430_s6  ;;  %s225_s10 = smov 48  ;;  %s230_s15 = smov 192 }
  0x18   :  { %v383_v60 = vld [vmem:[%s736_s0 + $0x7] ss:$16 sm:%s208_s29]   ;;  %v206_v61 = vsel %vm10_vm1, %v382_v59, %v201_v58  ;;  %v385_v0 = vld [vmem:[%s736_s0 + $0x6] ss:$16 sm:%s220_s9]   ;;  %s431_s16 = smov 56   ;;  %s239_s19 = smov 3 }
  0x19   :  { %v211_v63 = vsel %vm14_vm2, %v383_v60, %v206_v61  ;;  %v386_v1 = vld [vmem:[%s736_s0 + $0x6] ss:$16 sm:%s225_s10]   ;;  %v223_v2 = vsel %vm6_vm0, %v385_v0, %v384_v62  ;;  %s242_s20 = smov 12  ;;  %v388_v5 = vld [vmem:[%s736_s0 + $0x5] ss:$16 sm:%s239_s19]   ;;  %s247_s25 = smov 48 }
  0x1a   :  { %212 = vrot.lane.b32.xlu0 %v211_v63, %s431_s16  ;;  %v387_v3 = vld [vmem:[%s736_s0 + $0x6] ss:$16 sm:%s230_s15]   ;;  %v228_v4 = vsel %vm10_vm1, %v386_v1, %v223_v2  ;;  %s252_s26 = smov 192  ;;  %s261_s2 = smov 3 }
  0x1b   :  { %v389_v6 = vld [vmem:[%s736_s0 + $0x5] ss:$16 sm:%s242_s20]   ;;  %v233_v7 = vsel %vm14_vm2, %v387_v3, %v228_v4  ;;  %s432_s3 = smov 48   ;;  %v392_v12 = vld [vmem:[%s736_s0 + $0x4] ss:$16 sm:%s261_s2]   ;;  %s264_s6 = smov 12 }
  0x1c   :  { %v245_v8 = vsel %vm6_vm0, %v389_v6, %v388_v5  ;;  %v390_v9 = vld [vmem:[%s736_s0 + $0x5] ss:$16 sm:%s247_s25]   ;;  %234 = vrot.lane.b32.xlu1 %v233_v7, %s432_s3  ;;  %s269_s7 = smov 48  ;;  %s274_s12 = smov 192 }
  0x1d   :  { %v391_v10 = vld [vmem:[%s736_s0 + $0x5] ss:$16 sm:%s252_s26]   ;;  %v250_v11 = vsel %vm10_vm1, %v390_v9, %v245_v8  ;;  %v393_v14 = vld [vmem:[%s736_s0 + $0x4] ss:$16 sm:%s264_s6]   ;;  %s433_s13 = smov 40   ;;  %s283_s16 = smov 3 }
  0x1e   :  { %v255_v13 = vsel %vm14_vm2, %v391_v10, %v250_v11  ;;  %v394_v15 = vld [vmem:[%s736_s0 + $0x4] ss:$16 sm:%s269_s7]   ;;  %v267_v16 = vsel %vm6_vm0, %v393_v14, %v392_v12  ;;  %s286_s17 = smov 12  ;;  %v396_v19 = vld [vmem:[%s736_s0 + $0x3] ss:$16 sm:%s283_s16]   ;;  %s291_s22 = smov 48 }
  0x1f   :  { %256 = vrot.lane.b32.xlu0 %v255_v13, %s433_s13  ;;  %v395_v17 = vld [vmem:[%s736_s0 + $0x4] ss:$16 sm:%s274_s12]   ;;  %v272_v18 = vsel %vm10_vm1, %v394_v15, %v267_v16  ;;  %s296_s23 = smov 192  ;;  %s305_s28 = smov 3 }
  0x20   :  { %v397_v20 = vld [vmem:[%s736_s0 + $0x3] ss:$16 sm:%s286_s17]   ;;  %v277_v21 = vsel %vm14_vm2, %v395_v17, %v272_v18  ;;  %s434_s29 = smov 32   ;;  %v400_v26 = vld [vmem:[%s736_s0 + $0x2] ss:$16 sm:%s305_s28]   ;;  %s308_s3 = smov 12 }
  0x21   :  { %v289_v22 = vsel %vm6_vm0, %v397_v20, %v396_v19  ;;  %v398_v23 = vld [vmem:[%s736_s0 + $0x3] ss:$16 sm:%s291_s22]   ;;  %278 = vrot.lane.b32.xlu1 %v277_v21, %s434_s29  ;;  %s313_s4 = smov 48  ;;  %s318_s9 = smov 192 }
  0x22   :  { %v399_v24 = vld [vmem:[%s736_s0 + $0x3] ss:$16 sm:%s296_s23]   ;;  %v294_v25 = vsel %vm10_vm1, %v398_v23, %v289_v22  ;;  %v401_v28 = vld [vmem:[%s736_s0 + $0x2] ss:$16 sm:%s308_s3]   ;;  %s435_s10 = smov 24   ;;  %s327_s13 = smov 3 }
  0x23   :  { %v299_v27 = vsel %vm14_vm2, %v399_v24, %v294_v25  ;;  %v402_v29 = vld [vmem:[%s736_s0 + $0x2] ss:$16 sm:%s313_s4]   ;;  %v311_v30 = vsel %vm6_vm0, %v401_v28, %v400_v26  ;;  %s330_s14 = smov 12  ;;  %v404_v33 = vld [vmem:[%s736_s0 + $0x1] ss:$16 sm:%s327_s13]   ;;  %s335_s19 = smov 48 }
  0x24   :  { %300 = vrot.lane.b32.xlu0 %v299_v27, %s435_s10  ;;  %v403_v31 = vld [vmem:[%s736_s0 + $0x2] ss:$16 sm:%s318_s9]   ;;  %v316_v32 = vsel %vm10_vm1, %v402_v29, %v311_v30  ;;  %s340_s20 = smov 192  ;;  %s2_s25 = smov 3 }
  0x25   :  { %v405_v34 = vld [vmem:[%s736_s0 + $0x1] ss:$16 sm:%s330_s14]   ;;  %v321_v35 = vsel %vm14_vm2, %v403_v31, %v316_v32  ;;  %s436_s26 = smov 16   ;;  %s4_s27 = smov 12  ;;  %v3_v40 = vld [vmem:[%s736_s0] ss:$16 sm:%s2_s25]  }
  0x26   :  { %v333_v36 = vsel %vm6_vm0, %v405_v34, %v404_v33  ;;  %v406_v37 = vld [vmem:[%s736_s0 + $0x1] ss:$16 sm:%s335_s19]   ;;  %322 = vrot.lane.b32.xlu1 %v321_v35, %s436_s26  ;;  %s8_s28 = smov 48  ;;  %s12_s2 = smov 192 }
  0x27   :  { %v407_v38 = vld [vmem:[%s736_s0 + $0x1] ss:$16 sm:%s340_s20]   ;;  %v338_v39 = vsel %vm10_vm1, %v406_v37, %v333_v36  ;;  %v5_v42 = vld [vmem:[%s736_s0] ss:$16 sm:%s4_s27]   ;;  %s437_s7 = smov 8  }
  0x28   :  { %v343_v41 = vsel %vm14_vm2, %v407_v38, %v338_v39  ;;  %v9_v43 = vld [vmem:[%s736_s0] ss:$16 sm:%s8_s28]   ;;  %v7_v44 = vsel %vm6_vm0, %v5_v42, %v3_v40  ;;  %vm302_vm0 = vcmask 261312  }
  0x29   :  { %344 = vrot.lane.b32.xlu0 %v343_v41, %s437_s7  ;;  %v13_v45 = vld [vmem:[%s736_s0] ss:$16 sm:%s12_s2]   ;;  %v11_v46 = vsel %vm10_vm1, %v9_v43, %v7_v44  ;;  %vm324_vm1 = vcmask 195712  }
  0x2a   :  { %v15_v47 = vsel %vm14_vm2, %v13_v45, %v11_v46  ;;  %vm346_vm2 = vcmask 130112  }
  0x2b   :  { %17 = vst.msk [vmem:[%s737_s1] sm:$0xff] %vm16_vm3, %v15_v47  }
  0x78   :  { %v37_v48 = vpop.permute.xlu0 %36  }
  0x79   :  { %39 = vst.msk [vmem:[%s737_s1] sm:$0xff] %vm38_vm4, %v37_v48  }
  0x7a   :  { %v81_v49 = vpop.permute.xlu1 %80  }
  0x7d   :  { %v59_v50 = vpop.permute.xlu0 %58  }
  0x7e   :  { %61 = vst.msk [vmem:[%s737_s1] sm:$0xff] %vm60_vm5, %v59_v50  }
  0x7f   :  { %83 = vst.msk [vmem:[%s737_s1] sm:$0xff] %vm82_vm6, %v81_v49   ;;  %v103_v51 = vpop.permute.xlu1 %102  }
  0x80   :  { %105 = vst.msk [vmem:[%s737_s1] sm:$0xff] %vm104_vm7, %v103_v51  }
  0x82   :  { %v125_v52 = vpop.permute.xlu0 %124  }
  0x83   :  { %127 = vst.msk [vmem:[%s737_s1] sm:$0xff] %vm126_vm8, %v125_v52  }
  0x84   :  { %v147_v53 = vpop.permute.xlu1 %146  }
  0x85   :  { %149 = vst.msk [vmem:[%s737_s1] sm:$0xff] %vm148_vm9, %v147_v53  }
  0x87   :  { %v169_v54 = vpop.permute.xlu0 %168  }
  0x88   :  { %171 = vst.msk [vmem:[%s737_s1] sm:$0xff] %vm170_vm10, %v169_v54  }
  0x89   :  { %v191_v55 = vpop.permute.xlu1 %190  }
  0x8a   :  { %193 = vst.msk [vmem:[%s737_s1] sm:$0xff] %vm192_vm11, %v191_v55  }
  0x8c   :  { %v213_v56 = vpop.permute.xlu0 %212  }
  0x8d   :  { %215 = vst.msk [vmem:[%s737_s1] sm:$0xff] %vm214_vm12, %v213_v56  }
  0x8e   :  { %v235_v57 = vpop.permute.xlu1 %234  }
  0x8f   :  { %237 = vst.msk [vmem:[%s737_s1] sm:$0xff] %vm236_vm13, %v235_v57  }
  0x91   :  { %v257_v58 = vpop.permute.xlu0 %256  }
  0x92   :  { %259 = vst.msk [vmem:[%s737_s1] sm:$0xff] %vm258_vm14, %v257_v58  }
  0x93   :  { %v279_v59 = vpop.permute.xlu1 %278  }
  0x94   :  { %281 = vst.msk [vmem:[%s737_s1] sm:$0xff] %vm280_vm15, %v279_v59  }
  0x96   :  { %v301_v60 = vpop.permute.xlu0 %300  }
  0x97   :  { %303 = vst.msk [vmem:[%s737_s1] sm:$0xff] %vm302_vm0, %v301_v60  }
  0x98   :  { %v323_v61 = vpop.permute.xlu1 %322  }
  0x99   :  { %325 = vst.msk [vmem:[%s737_s1] sm:$0xff] %vm324_vm1, %v323_v61  }
  0x9b   :  { %v345_v62 = vpop.permute.xlu0 %344  }
  0x9c   :  { %347 = vst.msk [vmem:[%s737_s1] sm:$0xff] %vm346_vm2, %v345_v62  }

// kernel: tile.14
= control target key start
LH: loop header
LB: loop body
LE: loop exit
PB: predicated region body
PF: predicated region fallthrough
CT: control target
= control target key end

     0   :  { %vm6_vm0 = vcmask 1043458   ;;  %s11_s6 = smov 3  ;;  %s14_s7 = smov 12  ;;  %vm8_vm1 = vcmask 31744   ;;  %vm20_vm2 = vcmask 523744   ;;  %vm32_vm3 = vcmask 490944   ;;  %s383_s0 = inlined_call_operand.vmem [shape: f32[16,4,4], index: 0, kind: input, shape index: {}]   ;;  %s384_s1 = inlined_call_operand.vmem [shape: f32[64,4], index: 1, kind: output, shape index: {}]  }
   0x1   :  { %v198_v0 = vld [vmem:[%s383_s0 + $0xf] ss:$16 sm:%s11_s6]   ;;  %s35_s12 = smov 3  ;;  %s38_s15 = smov 12  ;;  %vm44_vm4 = vcmask 458144   ;;  %vm56_vm5 = vcmask 425344  }
   0x2   :  { %v199_v1 = vld [vmem:[%s383_s0 + $0xf] ss:$16 sm:%s14_s7]   ;;  %v202_v3 = vld [vmem:[%s383_s0 + $0xd] ss:$16 sm:%s35_s12]   ;;  %s243_s16 = smov 60   ;;  %s23_s19 = smov 3 }
   0x3   :  { %v17_v2 = vsel %vm6_vm0, %v199_v1, %v198_v0  ;;  %v203_v4 = vld [vmem:[%s383_s0 + $0xd] ss:$16 sm:%s38_s15]   ;;  %s26_s20 = smov 12  ;;  %v200_v6 = vld [vmem:[%s383_s0 + $0xe] ss:$16 sm:%s23_s19]   ;;  %s47_s25 = smov 3 }
   0x4   :  { %18 = vrot.lane.b32.xlu0 %v17_v2, %s243_s16  ;;  %v41_v5 = vsel %vm6_vm0, %v203_v4, %v202_v3  ;;  %v201_v7 = vld [vmem:[%s383_s0 + $0xe] ss:$16 sm:%s26_s20]   ;;  %s244_s26 = smov 52   ;;  %s50_s29 = smov 12  ;;  %vm68_vm6 = vcmask 392544   ;;  %vm80_vm7 = vcmask 359744  }
   0x5   :  { %42 = vrot.lane.b32.xlu1 %v41_v5, %s244_s26  ;;  %v29_v8 = vsel %vm6_vm0, %v201_v7, %v200_v6  ;;  %v204_v9 = vld [vmem:[%s383_s0 + $0xc] ss:$16 sm:%s47_s25]   ;;  %s59_s3 = smov 3  ;;  %s62_s4 = smov 12  ;;  %vm92_vm8 = vcmask 326944   ;;  %vm104_vm9 = vcmask 294144  }
   0x6   :  { %v205_v10 = vld [vmem:[%s383_s0 + $0xc] ss:$16 sm:%s50_s29]   ;;  %s245_s5 = smov 56   ;;  %v206_v12 = vld [vmem:[%s383_s0 + $0xb] ss:$16 sm:%s59_s3]   ;;  %s71_s8 = smov 3 }
   0x7   :  { %v53_v11 = vsel %vm6_vm0, %v205_v10, %v204_v9  ;;  %v207_v13 = vld [vmem:[%s383_s0 + $0xb] ss:$16 sm:%s62_s4]   ;;  %v208_v14 = vld [vmem:[%s383_s0 + $0xa] ss:$16 sm:%s71_s8]   ;;  %s74_s13 = smov 12  ;;  %s246_s14 = smov 48  }
   0x8   :  { %30 = vrot.lane.b32.xlu0 %v29_v8, %s245_s5  ;;  %v65_v15 = vsel %vm6_vm0, %v207_v13, %v206_v12  ;;  %v209_v16 = vld [vmem:[%s383_s0 + $0xa] ss:$16 sm:%s74_s13]   ;;  %s83_s17 = smov 3  ;;  %s86_s18 = smov 12  ;;  %vm116_vm10 = vcmask 261344   ;;  %vm128_vm11 = vcmask 228544  }
   0x9   :  { %54 = vrot.lane.b32.xlu1 %v53_v11, %s246_s14  ;;  %v77_v17 = vsel %vm6_vm0, %v209_v16, %v208_v14  ;;  %v210_v18 = vld [vmem:[%s383_s0 + $0x9] ss:$16 sm:%s83_s17]   ;;  %s95_s23 = smov 3  ;;  %s247_s24 = smov 44   ;;  %vm140_vm12 = vcmask 195744   ;;  %vm152_vm13 = vcmask 162944  }
   0xa   :  { %v211_v19 = vld [vmem:[%s383_s0 + $0x9] ss:$16 sm:%s86_s18]   ;;  %v212_v20 = vld [vmem:[%s383_s0 + $0x8] ss:$16 sm:%s95_s23]   ;;  %s98_s27 = smov 12  ;;  %s107_s30 = smov 3 }
   0xb   :  { %v89_v21 = vsel %vm6_vm0, %v211_v19, %v210_v18  ;;  %v213_v22 = vld [vmem:[%s383_s0 + $0x8] ss:$16 sm:%s98_s27]   ;;  %s110_s2 = smov 12  ;;  %s248_s3 = smov 40   ;;  %v214_v23 = vld [vmem:[%s383_s0 + $0x7] ss:$16 sm:%s107_s30]  }
   0xc   :  { %66 = vrot.lane.b32.xlu0 %v65_v15, %s247_s24  ;;  %s119_s6 = smov 3  ;;  %v101_v24 = vsel %vm6_vm0, %v213_v22, %v212_v20  ;;  %v215_v25 = vld [vmem:[%s383_s0 + $0x7] ss:$16 sm:%s110_s2]   ;;  %s122_s11 = smov 12  ;;  %vm164_vm14 = vcmask 130144   ;;  %vm176_vm15 = vcmask 97344  }
   0xd   :  { %78 = vrot.lane.b32.xlu1 %v77_v17, %s248_s3  ;;  %v216_v26 = vld [vmem:[%s383_s0 + $0x6] ss:$16 sm:%s119_s6]   ;;  %s249_s12 = smov 36   ;;  %s131_s15 = smov 3  ;;  %v113_v28 = vsel %vm6_vm0, %v215_v25, %v214_v23 }
   0xe   :  { %v217_v27 = vld [vmem:[%s383_s0 + $0x6] ss:$16 sm:%s122_s11]   ;;  %s134_s16 = smov 12  ;;  %v218_v29 = vld [vmem:[%s383_s0 + $0x5] ss:$16 sm:%s131_s15]   ;;  %s143_s19 = smov 3 }
   0xf   :  { %s250_s20 = smov 32   ;;  %v219_v30 = vld [vmem:[%s383_s0 + $0x5] ss:$16 sm:%s134_s16]   ;;  %s146_s23 = smov 12  ;;  %v125_v31 = vsel %vm6_vm0, %v217_v27, %v216_v26  ;;  %v220_v32 = vld [vmem:[%s383_s0 + $0x4] ss:$16 sm:%s143_s19]  }
  0x10   :  { %90 = vrot.lane.b32.xlu0 %v89_v21, %s249_s12  ;;  %s155_s26 = smov 3  ;;  %s158_s27 = smov 12  ;;  %v221_v33 = vld [vmem:[%s383_s0 + $0x4] ss:$16 sm:%s146_s23]   ;;  %v137_v34 = vsel %vm6_vm0, %v219_v30, %v218_v29 }
  0x11   :  { %102 = vrot.lane.b32.xlu1 %v101_v24, %s250_s20  ;;  %s251_s28 = smov 28   ;;  %s167_s2 = smov 3  ;;  %v222_v35 = vld [vmem:[%s383_s0 + $0x3] ss:$16 sm:%s155_s26]   ;;  %v149_v37 = vsel %vm6_vm0, %v221_v33, %v220_v32 }
  0x12   :  { %s170_s5 = smov 12  ;;  %s252_s6 = smov 24   ;;  %v223_v36 = vld [vmem:[%s383_s0 + $0x3] ss:$16 sm:%s158_s27]   ;;  %v224_v38 = vld [vmem:[%s383_s0 + $0x2] ss:$16 sm:%s167_s2]  }
  0x13   :  { %s179_s9 = smov 3  ;;  %v225_v39 = vld [vmem:[%s383_s0 + $0x2] ss:$16 sm:%s170_s5]   ;;  %s182_s14 = smov 12  ;;  %v161_v41 = vsel %vm6_vm0, %v223_v36, %v222_v35 }
  0x14   :  { %114 = vrot.lane.b32.xlu0 %v113_v28, %s251_s28  ;;  %s2_s15 = smov 3  ;;  %s253_s16 = smov 20   ;;  %v226_v42 = vld [vmem:[%s383_s0 + $0x1] ss:$16 sm:%s179_s9]   ;;  %v173_v46 = vsel %vm6_vm0, %v225_v39, %v224_v38 }
  0x15   :  { %126 = vrot.lane.b32.xlu1 %v125_v31, %s252_s6  ;;  %v3_v40 = vld [vmem:[%s383_s0] ss:$16 sm:%s2_s15]   ;;  %s4_s19 = smov 12  ;;  %s254_s24 = smov 16  }
  0x16   :  { %v5_v43 = vld [vmem:[%s383_s0] ss:$16 sm:%s4_s19]   ;;  %v227_v44 = vld [vmem:[%s383_s0 + $0x1] ss:$16 sm:%s182_s14]   ;;  %s255_s0 = smov 12   ;;  %s256_s27 = smov 8  }
  0x17   :  { %v7_v45 = vsel %vm6_vm0, %v5_v43, %v3_v40  ;;  %v185_v47 = vsel %vm6_vm0, %v227_v44, %v226_v42  ;;  %s257_s28 = smov 4   ;;  %vm188_vm0 = vcmask 64544  }
  0x18   :  { %138 = vrot.lane.b32.xlu0 %v137_v34, %s253_s16  ;;  %9 = vst.msk [vmem:[#allocation0] sm:$0xf] %vm8_vm1, %v7_v45  }
  0x19   :  { %150 = vrot.lane.b32.xlu1 %v149_v37, %s254_s24 }
  0x1c   :  { %162 = vrot.lane.b32.xlu0 %v161_v41, %s255_s0 }
  0x1d   :  { %174 = vrot.lane.b32.xlu1 %v173_v46, %s256_s27 }
  0x20   :  { %186 = vrot.lane.b32.xlu0 %v185_v47, %s257_s28 }
  0x76   :  { %v19_v48 = vpop.permute.xlu0 %18  }
  0x77   :  { %21 = vst.msk [vmem:[#allocation0] sm:$0xf] %vm20_vm2, %v19_v48   ;;  %v43_v49 = vpop.permute.xlu1 %42  }
  0x7a   :  { %v31_v50 = vpop.permute.xlu0 %30  }
  0x7b   :  { %33 = vst.msk [vmem:[#allocation0] sm:$0xf] %vm32_vm3, %v31_v50   ;;  %v55_v51 = vpop.permute.xlu1 %54  }
  0x7c   :  { %45 = vst.msk [vmem:[#allocation0] sm:$0xf] %vm44_vm4, %v43_v49  }
  0x7d   :  { %57 = vst.msk [vmem:[#allocation0] sm:$0xf] %vm56_vm5, %v55_v51  }
  0x7e   :  { %v67_v52 = vpop.permute.xlu0 %66  }
  0x7f   :  { %69 = vst.msk [vmem:[#allocation0] sm:$0xf] %vm68_vm6, %v67_v52   ;;  %v79_v53 = vpop.permute.xlu1 %78  }
  0x80   :  { %81 = vst.msk [vmem:[#allocation0] sm:$0xf] %vm80_vm7, %v79_v53  }
  0x82   :  { %v91_v54 = vpop.permute.xlu0 %90  }
  0x83   :  { %93 = vst.msk [vmem:[#allocation0] sm:$0xf] %vm92_vm8, %v91_v54   ;;  %v103_v55 = vpop.permute.xlu1 %102  }
  0x84   :  { %105 = vst.msk [vmem:[#allocation0] sm:$0xf] %vm104_vm9, %v103_v55  }
  0x86   :  { %v115_v56 = vpop.permute.xlu0 %114  }
  0x87   :  { %117 = vst.msk [vmem:[#allocation0] sm:$0xf] %vm116_vm10, %v115_v56   ;;  %v127_v57 = vpop.permute.xlu1 %126  }
  0x88   :  { %129 = vst.msk [vmem:[#allocation0] sm:$0xf] %vm128_vm11, %v127_v57  }
  0x8a   :  { %v139_v58 = vpop.permute.xlu0 %138  }
  0x8b   :  { %141 = vst.msk [vmem:[#allocation0] sm:$0xf] %vm140_vm12, %v139_v58   ;;  %v151_v59 = vpop.permute.xlu1 %150  }
  0x8c   :  { %153 = vst.msk [vmem:[#allocation0] sm:$0xf] %vm152_vm13, %v151_v59  }
  0x8e   :  { %v163_v60 = vpop.permute.xlu0 %162  }
  0x8f   :  { %165 = vst.msk [vmem:[#allocation0] sm:$0xf] %vm164_vm14, %v163_v60   ;;  %v175_v61 = vpop.permute.xlu1 %174  }
  0x90   :  { %177 = vst.msk [vmem:[#allocation0] sm:$0xf] %vm176_vm15, %v175_v61  }
  0x92   :  { %v187_v62 = vpop.permute.xlu0 %186  }
  0x93   :  { %189 = vst.msk [vmem:[#allocation0] sm:$0xf] %vm188_vm0, %v187_v62  }
  0x9a   :  { %v194_v63 = vld [vmem:[#allocation0] sm:$0xf] }
  0x9b   :  { %197 = vst [vmem:[%s384_s1] sm:$0xf] %v194_v63 }

// kernel: cnn_block_nhwc.1
= control target key start
LH: loop header
LB: loop body
LE: loop exit
PB: predicated region body
PF: predicated region fallthrough
CT: control target
= control target key end

     0   :  { %v1452_v0 = vmov 0.0   ;;  %vm39_vm0 = vcmask 523264   ;;  %vm1453_vm1 = vmmov 0   ;;  %vm240_vm2 = vcmask 1043456   ;;  %s1845_s6 = inlined_call_operand.vmem [shape: f32[64,4], index: 6, kind: input, shape index: {}]   ;;  %s1846_s0 = inlined_call_operand.vmem [shape: f32[32,64], index: 0, kind: input, shape index: {}]   ;;  %s1847_s7 = inlined_call_operand.vmem [shape: f32[4,64], index: 7, kind: input, shape index: {}]   ;;  %s1848_s2 = inlined_call_operand.vmem [shape: f32[1,4], index: 2, kind: input, shape index: {}]   ;;  %s1849_s3 = inlined_call_operand.vmem [shape: f32[1,4], index: 3, kind: input, shape index: {}]   ;;  %s1850_s1 = inlined_call_operand.vmem [shape: f32[3,64,128], index: 1, kind: input, shape index: {}]   ;;  %s1851_s8 = inlined_call_operand.vmem [shape: f32[128,8], index: 8, kind: input, shape index: {}]   ;;  %s1852_s9 = inlined_call_operand.vmem [shape: f32[8,128], index: 9, kind: input, shape index: {}]   ;;  %s1853_s4 = inlined_call_operand.vmem [shape: f32[1,8], index: 4, kind: input, shape index: {}]   ;;  %s1854_s5 = inlined_call_operand.vmem [shape: f32[1,8], index: 5, kind: input, shape index: {}]   ;;  %s1855_s10 = inlined_call_operand.vmem [shape: f32[32,128], index: 10, kind: output, shape index: {}]  }
   0x1   :  { %1252 = vmatprep.subr.mxu0 %v1452_v0  ;;  %v60_v1 = vld [vmem:[%s1845_s6 + $0x38] sm:$0xff]  ;;  %1271 = vmatprep.subr.mxu1 %v1452_v0  ;;  %v59_v2 = vld [vmem:[%s1845_s6 + $0x30] sm:$0xff]  ;;  %v58_v3 = vld [vmem:[%s1845_s6 + $0x28] sm:$0xff]  ;;  %vm236_vm3 = vcmask 31744   ;;  %vm403_vm4 = vcmask 516096   ;;  %vm432_vm5 = vcmask 1046528  }
   0x2   :  { %1253 = vmatpush3.msra.mxu0 %v60_v1  ;;  %1272 = vmatpush3.msra.mxu1 %v60_v1  ;;  %v1525_v4 = vld [vmem:[%s1846_s0] sm:$0xff]  ;;  %v1530_v5 = vld [vmem:[%s1846_s0 + $0x8] sm:$0xff]  ;;  %v1535_v6 = vld [vmem:[%s1846_s0 + $0x10] sm:$0xff]  ;;  %404 = vst.msk [vmem:[#allocation2] sm:$0x1] %vm403_vm4, %v1452_v0  ;;  %vm638_vm6 = vcmask 1045504  }
   0x3   :  { %1254 = vmatprep.subr.mxu0 %v1452_v0  ;;  %1273 = vmatprep.subr.mxu1 %v1452_v0  ;;  %v1540_v7 = vld [vmem:[%s1846_s0 + $0x18] sm:$0xff]  ;;  %v40_v8 = vsel %vm39_vm0, %v1525_v4, 0.0  ;;  %v135_v9 = vmul.f32 %v1525_v4, %v1525_v4  ;;  %v57_v10 = vld [vmem:[%s1845_s6 + $0x20] sm:$0xff]  ;;  %v41_v11 = vsel %vm39_vm0, %v1530_v5, 0.0  ;;  %v43_v12 = vsel %vm39_vm0, %v1535_v6, 0.0  ;;  %v55_v24 = vld [vmem:[%s1845_s6 + $0x10] sm:$0xff] }
   0x4   :  { %1255 = vmatpush3.msra.mxu0 %v59_v2  ;;  %1274 = vmatpush3.msra.mxu1 %v59_v2  ;;  %v136_v13 = vmul.f32 %v1530_v5, %v1530_v5  ;;  %v42_v14 = vadd.f32 %v41_v11, %v40_v8  ;;  %v137_v15 = vmul.f32 %v1535_v6, %v1535_v6  ;;  %v56_v18 = vld [vmem:[%s1845_s6 + $0x18] sm:$0xff]  ;;  %v45_v19 = vsel %vm39_vm0, %v1540_v7, 0.0  ;;  %v54_v28 = vld [vmem:[%s1845_s6 + $0x8] sm:$0xff]  ;;  %v53_v31 = vld [vmem:[%s1845_s6] sm:$0xff] }
   0x5   :  { %1256 = vmatprep.subr.mxu0 %v1452_v0  ;;  %1275 = vmatprep.subr.mxu1 %v1452_v0  ;;  %v138_v16 = vmul.f32 %v1540_v7, %v1540_v7  ;;  %v139_v17 = vsel %vm39_vm0, %v135_v9, 0.0  ;;  %v235_v43 = vld [vmem:[%s1847_s7] sm:$0xf]  ;;  %v425_v59 = vld [vmem:[%s1850_s1 + $0x38] sm:$0xff]  ;;  %v424_v61 = vld [vmem:[%s1850_s1 + $0x30] sm:$0xff]  ;;  %vm945_vm7 = vcmask 64512  }
   0x6   :  { %1257 = vmatpush3.msra.mxu0 %v58_v3  ;;  %1276 = vmatpush3.msra.mxu1 %v58_v3  ;;  %v140_v20 = vsel %vm39_vm0, %v136_v13, 0.0  ;;  %v44_v21 = vadd.f32 %v43_v12, %v42_v14  ;;  %v142_v23 = vsel %vm39_vm0, %v137_v15, 0.0  ;;  %v228_v53 = vld [vmem:[%s1848_s2] sm:$0x1]  ;;  %v1133_v60 = vld [vmem:[%s1850_s1 + $0x78] sm:$0xff]  ;;  %v1132_v62 = vld [vmem:[%s1850_s1 + $0x70] sm:$0xff] }
   0x7   :  { %1258 = vmatprep.subr.mxu0 %v1452_v0  ;;  %1277 = vmatprep.subr.mxu1 %v1452_v0  ;;  %v141_v22 = vadd.f32 %v140_v20, %v139_v17  ;;  %v144_v25 = vsel %vm39_vm0, %v138_v16, 0.0  ;;  %v232_v56 = vld [vmem:[%s1849_s3] sm:$0x1]  ;;  %v423_v63 = vld [vmem:[%s1850_s1 + $0x28] sm:$0xff]  ;;  %v421_v8 = vld [vmem:[%s1850_s1 + $0x18] sm:$0xff]  ;;  %v387_v17 = vlaneseq }
   0x8   :  { %1259 = vmatpush3.msra.mxu0 %v57_v10  ;;  %1278 = vmatpush3.msra.mxu1 %v57_v10  ;;  %v46_v26 = vadd.f32 %v45_v19, %v44_v21  ;;  %v1131_v1 = vld [vmem:[%s1850_s1 + $0x68] sm:$0xff]  ;;  %v422_v2 = vld [vmem:[%s1850_s1 + $0x20] sm:$0xff]  ;;  %v1129_v9 = vld [vmem:[%s1850_s1 + $0x58] sm:$0xff]  ;;  %405 = vst.msk [vmem:[#allocation2 + $0x18] sm:$0x1] %vm403_vm4, %v1452_v0 }
   0x9   :  { %1260 = vmatprep.subr.mxu0 %v1452_v0  ;;  %1279 = vmatprep.subr.mxu1 %v1452_v0  ;;  %v143_v27 = vadd.f32 %v142_v23, %v141_v22  ;;  %v1130_v3 = vld [vmem:[%s1850_s1 + $0x60] sm:$0xff]  ;;  %406 = vst.msk [vmem:[#allocation2 + $0x11] sm:$0x1] %vm403_vm4, %v1452_v0  ;;  %407 = vst.msk [vmem:[#allocation2 + $0x29] sm:$0x1] %vm403_vm4, %v1452_v0  ;;  %v420_v10 = vld [vmem:[%s1850_s1 + $0x10] sm:$0xff] }
   0xa   :  { %1261 = vmatpush3.msra.mxu0 %v56_v18  ;;  %1280 = vmatpush3.msra.mxu1 %v56_v18  ;;  %v47_v29 = vrot.slane %v46_v26, 4  ;;  %v1128_v11 = vld [vmem:[%s1850_s1 + $0x50] sm:$0xff]  ;;  %v419_v12 = vld [vmem:[%s1850_s1 + $0x8] sm:$0xff]  ;;  %v418_v14 = vld [vmem:[%s1850_s1] sm:$0xff]  ;;  %v388_v18 = vshrl.u32 %v387_v17, 7 }
   0xb   :  { %1262 = vmatprep.subr.mxu0 %v1452_v0  ;;  %1281 = vmatprep.subr.mxu1 %v1452_v0  ;;  %v145_v30 = vadd.f32 %v144_v25, %v143_v27  ;;  %v1127_v13 = vld [vmem:[%s1850_s1 + $0x48] sm:$0xff]  ;;  %v1126_v15 = vld [vmem:[%s1850_s1 + $0x40] sm:$0xff]  ;;  %v1149_v16 = vld [vmem:[%s1850_s1 + $0xb8] sm:$0xff] }
   0xc   :  { %1263 = vmatpush3.msra.mxu0 %v55_v24  ;;  %1282 = vmatpush3.msra.mxu1 %v55_v24  ;;  %v48_v32 = vadd.f32 %v47_v29, %v46_v26  ;;  %v1668_v19 = vsub.s32 0, %v388_v18  ;;  %v766_v17 = vld [vmem:[%s1851_s8 + $0x10] sm:$0xff]  ;;  %v765_v18 = vld [vmem:[%s1851_s8 + $0x8] sm:$0xff] }
   0xd   :  { %1264 = vmatprep.subr.mxu0 %v1452_v0  ;;  %1283 = vmatprep.subr.mxu1 %v1452_v0  ;;  %v146_v33 = vrot.slane %v145_v30, 4 }
   0xe   :  { %1265 = vmatpush3.msra.mxu0 %v54_v28  ;;  %1268 = vmatprep.mubr.msk.f32.mxu0 %vm1453_vm1, %v1452_v0  ;;  %v49_v34 = vrot.slane %v48_v32, 2 }
   0xf   :  { %1266 = vmatprep.subr.mxu0 %v1452_v0  ;;  %1284 = vmatpush3.msra.mxu1 %v54_v28  ;;  %v147_v35 = vadd.f32 %v146_v33, %v145_v30 }
  0x10   :  { %1267 = vmatpush3.msra.mxu0 %v53_v31  ;;  %1285 = vmatprep.subr.mxu1 %v1452_v0  ;;  %v50_v36 = vadd.f32 %v49_v34, %v48_v32 }
  0x11   :  { %1286 = vmatpush3.msra.mxu1 %v53_v31  ;;  %1287 = vmatprep.mubr.msk.f32.mxu1 %vm1453_vm1, %v1452_v0  ;;  %v148_v37 = vrot.slane %v147_v35, 2 }
  0x12   :  { %1290 = vmatprep.subr.mxu1 %v1452_v0  ;;  %v51_v38 = vrot.slane %v50_v36, 1  ;;  %1300 = vmatprep.subr.mxu0 %v1133_v60 }
  0x13   :  { %v149_v39 = vadd.f32 %v148_v37, %v147_v35 }
  0x14   :  { %v52_v40 = vadd.f32 %v51_v38, %v50_v36 }
  0x15   :  { %v150_v41 = vrot.slane %v149_v39, 1 }
  0x16   :  { %1269 = vmatmul.mubr.msk.f32.vlgmr.msra.gmra.mxu0 %vm39_vm0, %v52_v40 }
  0x17   :  { %v151_v42 = vadd.f32 %v150_v41, %v149_v39  ;;  %1301 = vmatpush3.msra.mxu0 %v1133_v60 }
  0x18   :  { %1302 = vmatprep.subr.mxu0 %v1132_v62 }
  0x19   :  { %1288 = vmatmul.mubr.msk.f32.vlgmr.msra.gmra.mxu1 %vm39_vm0, %v151_v42  ;;  %1303 = vmatpush3.msra.mxu0 %v1132_v62 }
  0x1a   :  { %1292 = vmatprep.mubr.msk.f32.mxu1 %vm1453_vm1, %v1452_v0  ;;  %1291 = vmatpush3.msk.msra.mxu1 %vm240_vm2, %v235_v43 }
  0x1b   :  { %1295 = vmatprep.subr.mxu1 %v1452_v0  ;;  %1304 = vmatprep.subr.mxu0 %v1131_v1 }
  0x1c   :  { %1305 = vmatpush3.msra.mxu0 %v1131_v1  ;;  %v778_v1 = vld [vmem:[%s1851_s8 + $0x70] sm:$0xff] }
  0x1d   :  { %1306 = vmatprep.subr.mxu0 %v1130_v3 }
  0x1e   :  { %1307 = vmatpush3.msra.mxu0 %v1130_v3  ;;  %v776_v3 = vld [vmem:[%s1851_s8 + $0x60] sm:$0xff] }
  0x1f   :  { %1308 = vmatprep.subr.mxu0 %v1129_v9 }
  0x20   :  { %1309 = vmatpush3.msra.mxu0 %v1129_v9  ;;  %v774_v9 = vld [vmem:[%s1851_s8 + $0x50] sm:$0xff] }
  0x21   :  { %1310 = vmatprep.subr.mxu0 %v1128_v11 }
  0x22   :  { %1311 = vmatpush3.msra.mxu0 %v1128_v11  ;;  %v772_v11 = vld [vmem:[%s1851_s8 + $0x40] sm:$0xff] }
  0x23   :  { %1312 = vmatprep.subr.mxu0 %v1127_v13 }
  0x24   :  { %1313 = vmatpush3.msra.mxu0 %v1127_v13  ;;  %v770_v13 = vld [vmem:[%s1851_s8 + $0x30] sm:$0xff] }
  0x25   :  { %1314 = vmatprep.subr.mxu0 %v1126_v15 }
  0x26   :  { %1315 = vmatpush3.msra.mxu0 %v1126_v15  ;;  %v768_v15 = vld [vmem:[%s1851_s8 + $0x20] sm:$0xff] }
  0x27   :  { %1344 = vmatprep.subr.mxu0 %v1149_v16 }
  0xd6   :  { %v130_v44 = vpop.f32.mrf.mxu0 }
  0xd7   :  { %v134_v45 = vmul.f32 0.001953125, %v130_v44 }
  0xd8   :  { %v1270_v46 = vpop.f32.mrf.mxu0 }
  0xd9   :  { %v221_v47 = vpop.f32.mrf.mxu1  ;;  %v226_v48 = vmul.f32 %v134_v45, %v134_v45 }
  0xda   :  { %v225_v49 = vmul.f32 0.001953125, %v221_v47 }
  0xdb   :  { %v1289_v50 = vpop.f32.mrf.mxu1 }
  0xdc   :  { %v227_v51 = vsub.f32 %v225_v49, %v226_v48  ;;  %v1147_v48 = vld [vmem:[%s1850_s1 + $0xa8] sm:$0xff]  ;;  %v1146_v50 = vld [vmem:[%s1850_s1 + $0xa0] sm:$0xff] }
  0xde   :  { %v229_v52 = vadd.f32 1e-05, %v227_v51 }
  0xe0   :  { %1448 = vrsqrt.f32 %v229_v52  ;;  %v1145_v52 = vld [vmem:[%s1850_s1 + $0x98] sm:$0xff] }
  0xed   :  { %v1449_v54 = vpop.eup %1448 }
  0xee   :  { %v231_v55 = vmul.f32 %v1449_v54, %v228_v53  ;;  %v1144_v53 = vld [vmem:[%s1850_s1 + $0x90] sm:$0xff]  ;;  %v1143_v54 = vld [vmem:[%s1850_s1 + $0x88] sm:$0xff] }
  0xf0   :  { %1293 = vmatmul.mubr.msk.f32.vlgmr.msra.gmra.mxu1 %vm236_vm3, %v231_v55  ;;  %v233_v57 = vmul.f32 %v231_v55, %v134_v45 }
  0xf1   :  { %1296 = vmatpush3.msk.msra.mxu1 %vm240_vm2, %v235_v43  ;;  %1297 = vmatprep.mubr.msk.f32.mxu1 %vm1453_vm1, %v1452_v0  ;;  %v1148_v43 = vld [vmem:[%s1850_s1 + $0xb0] sm:$0xff] }
  0xf2   :  { %v234_v58 = vsub.f32 %v232_v56, %v233_v57  ;;  %1322 = vmatprep.subr.mxu1 %v425_v59  ;;  %v1142_v56 = vld [vmem:[%s1850_s1 + $0x80] sm:$0xff] }
  0xf4   :  { %1298 = vmatmul.mubr.msk.f32.vlgmr.msra.gmra.mxu1 %vm236_vm3, %v234_v58 }
  0xf5   :  { %1323 = vmatpush3.msra.mxu1 %v425_v59 }
  0xf6   :  { %1324 = vmatprep.subr.mxu1 %v424_v61 }
  0xf7   :  { %1325 = vmatpush3.msra.mxu1 %v424_v61 }
  0xf8   :  { %1326 = vmatprep.subr.mxu1 %v423_v63 }
  0xf9   :  { %1327 = vmatpush3.msra.mxu1 %v423_v63  ;;  %v779_v63 = vld [vmem:[%s1851_s8 + $0x78] sm:$0xff] }
  0xfa   :  { %1328 = vmatprep.subr.mxu1 %v422_v2 }
  0xfb   :  { %1329 = vmatpush3.msra.mxu1 %v422_v2  ;;  %v777_v2 = vld [vmem:[%s1851_s8 + $0x68] sm:$0xff] }
  0xfc   :  { %1330 = vmatprep.subr.mxu1 %v421_v8 }
  0xfd   :  { %1331 = vmatpush3.msra.mxu1 %v421_v8  ;;  %v775_v8 = vld [vmem:[%s1851_s8 + $0x58] sm:$0xff] }
  0xfe   :  { %1332 = vmatprep.subr.mxu1 %v420_v10 }
  0xff   :  { %1333 = vmatpush3.msra.mxu1 %v420_v10  ;;  %v773_v10 = vld [vmem:[%s1851_s8 + $0x48] sm:$0xff] }
 0x100   :  { %1334 = vmatprep.subr.mxu1 %v419_v12 }
 0x101   :  { %1335 = vmatpush3.msra.mxu1 %v419_v12  ;;  %v771_v12 = vld [vmem:[%s1851_s8 + $0x38] sm:$0xff] }
 0x102   :  { %1336 = vmatprep.subr.mxu1 %v418_v14 }
 0x103   :  { %1337 = vmatpush3.msra.mxu1 %v418_v14  ;;  %v769_v14 = vld [vmem:[%s1851_s8 + $0x28] sm:$0xff] }
 0x104   :  { %1366 = vmatprep.subr.mxu1 %v1452_v0 }
 0x1b0   :  { %v310_v20 = vpop.f32.mrf.mxu1 }
 0x1b1   :  { %v390_v21 = vrot.slane %v310_v20, %v1668_v19  ;;  %v764_v20 = vld [vmem:[%s1851_s8] sm:$0xff] }
 0x1b2   :  { %v1294_v22 = vpop.f32.mrf.mxu1 }
 0x1b3   :  { %v391_v23 = vmul.f32 %v390_v21, %v1525_v4  ;;  %v392_v25 = vmul.f32 %v390_v21, %v1530_v5  ;;  %v393_v26 = vmul.f32 %v390_v21, %v1535_v6  ;;  %v394_v27 = vmul.f32 %v390_v21, %v1540_v7 }
 0x1b4   :  { %v383_v24 = vpop.f32.mrf.mxu1 }
 0x1b5   :  { %v398_v28 = vrot.slane %v383_v24, %v1668_v19 }
 0x1b6   :  { %v1299_v29 = vpop.f32.mrf.mxu1 }
 0x1b7   :  { %v399_v30 = vadd.f32 %v398_v28, %v391_v23  ;;  %v400_v31 = vadd.f32 %v398_v28, %v392_v25  ;;  %v401_v32 = vadd.f32 %v398_v28, %v393_v26  ;;  %v402_v33 = vadd.f32 %v398_v28, %v394_v27 }
 0x1b9   :  { %408 = vst.msk [vmem:[#allocation2 + $0x1] sm:$0xff] %vm39_vm0, %v399_v30  ;;  %409 = vst.msk [vmem:[#allocation2 + $0x9] sm:$0xff] %vm39_vm0, %v400_v31 }
 0x1ba   :  { %410 = vst.msk [vmem:[#allocation2 + $0x19] sm:$0xff] %vm39_vm0, %v401_v32  ;;  %411 = vst.msk [vmem:[#allocation2 + $0x21] sm:$0xff] %vm39_vm0, %v402_v33 }
 0x1c0   :  { %v412_v4 = vld [vmem:[#allocation2] sm:$0xff]  ;;  %v413_v5 = vld [vmem:[#allocation2 + $0x8] sm:$0xff]  ;;  %v414_v7 = vld [vmem:[#allocation2 + $0x10] sm:$0x3] }
 0x1c1   :  { %v415_v6 = vld [vmem:[#allocation2 + $0x18] sm:$0xff]  ;;  %v433_v34 = vrot.slane %v412_v4, 1  ;;  %1338 = vmatprep.mubr.msk.f32.mxu1 %vm39_vm0, %v412_v4  ;;  %v434_v36 = vrot.slane %v413_v5, 1  ;;  %v436_v37 = vrot.slane %v414_v7, 1  ;;  %v416_v38 = vld [vmem:[#allocation2 + $0x20] sm:$0xff]  ;;  %v639_v45 = vrot.slane %v412_v4, 2 }
 0x1c2   :  { %1339 = vmatmul.mubr.msk.f32.vlgmr.msra.gmra.mxu1 %vm39_vm0, %v413_v5  ;;  %v438_v35 = vrot.slane %v415_v6, 1  ;;  %v417_v39 = vld [vmem:[#allocation2 + $0x28] sm:$0x3]  ;;  %v439_v40 = vrot.slane %v416_v38, 1  ;;  %v640_v47 = vrot.slane %v413_v5, 2  ;;  %v642_v55 = vrot.slane %v414_v7, 2 }
 0x1c3   :  { %1341 = vmatprep.mubr.msk.f32.mxu1 %vm39_vm0, %v415_v6  ;;  %v435_v41 = vsel %vm432_vm5, %v433_v34, %v434_v36  ;;  %v437_v42 = vsel %vm432_vm5, %v434_v36, %v436_v37  ;;  %v441_v44 = vrot.slane %v417_v39, 1  ;;  %v644_v57 = vrot.slane %v415_v6, 2  ;;  %1367 = vmatpush3.msra.mxu1 %v779_v63 }
 0x1c4   :  { %1316 = vmatprep.mubr.msk.f32.mxu0 %vm39_vm0, %v435_v41  ;;  %v440_v46 = vsel %vm432_vm5, %v438_v35, %v439_v40  ;;  %v641_v51 = vsel %vm638_vm6, %v639_v45, %v640_v47  ;;  %v645_v58 = vrot.slane %v416_v38, 2  ;;  %v643_v59 = vsel %vm638_vm6, %v640_v47, %v642_v55  ;;  %1368 = vmatprep.subr.mxu1 %v1452_v0 }
 0x1c5   :  { %1317 = vmatmul.mubr.msk.f32.vlgmr.msra.gmra.mxu0 %vm39_vm0, %v437_v42  ;;  %v442_v49 = vsel %vm432_vm5, %v439_v40, %v441_v44  ;;  %v647_v60 = vrot.slane %v417_v39, 2  ;;  %1369 = vmatpush3.msra.mxu1 %v778_v1 }
 0x1c6   :  { %1342 = vmatmul.mubr.msk.f32.gmra.mxu1 %vm39_vm0, %v416_v38  ;;  %1345 = vmatpush3.msra.mxu0 %v1149_v16  ;;  %v646_v61 = vsel %vm638_vm6, %v644_v57, %v645_v58  ;;  %v767_v16 = vld [vmem:[%s1851_s8 + $0x18] sm:$0xff] }
 0x1c7   :  { %1319 = vmatprep.mubr.msk.f32.mxu0 %vm39_vm0, %v440_v46  ;;  %1346 = vmatprep.subr.mxu0 %v1148_v43  ;;  %v648_v62 = vsel %vm638_vm6, %v645_v58, %v647_v60 }
 0x1c8   :  { %1398 = vmatprep.mubr.msk.f32.mxu1 %vm1453_vm1, %v1452_v0  ;;  %1347 = vmatpush3.msra.mxu0 %v1148_v43 }
 0x1c9   :  { %1348 = vmatprep.subr.mxu0 %v1147_v48  ;;  %1320 = vmatmul.mubr.msk.f32.gmra.mxu0 %vm39_vm0, %v442_v49 }
 0x1ca   :  { %1349 = vmatpush3.msra.mxu0 %v1147_v48  ;;  %1360 = vmatprep.mubr.msk.f32.mxu0 %vm39_vm0, %v641_v51 }
 0x1cb   :  { %1350 = vmatprep.subr.mxu0 %v1146_v50  ;;  %1370 = vmatprep.subr.mxu1 %v1452_v0 }
 0x1cc   :  { %1351 = vmatpush3.msra.mxu0 %v1146_v50  ;;  %1371 = vmatpush3.msra.mxu1 %v777_v2 }
 0x1cd   :  { %1352 = vmatprep.subr.mxu0 %v1145_v52  ;;  %1372 = vmatprep.subr.mxu1 %v1452_v0 }
 0x1ce   :  { %1353 = vmatpush3.msra.mxu0 %v1145_v52  ;;  %1373 = vmatpush3.msra.mxu1 %v776_v3 }
 0x1cf   :  { %1354 = vmatprep.subr.mxu0 %v1144_v53  ;;  %1374 = vmatprep.subr.mxu1 %v1452_v0 }
 0x1d0   :  { %1355 = vmatpush3.msra.mxu0 %v1144_v53  ;;  %1375 = vmatpush3.msra.mxu1 %v775_v8 }
 0x1d1   :  { %1356 = vmatprep.subr.mxu0 %v1143_v54  ;;  %1376 = vmatprep.subr.mxu1 %v1452_v0 }
 0x1d2   :  { %1357 = vmatpush3.msra.mxu0 %v1143_v54  ;;  %1377 = vmatpush3.msra.mxu1 %v774_v9 }
 0x1d3   :  { %1358 = vmatprep.subr.mxu0 %v1142_v56  ;;  %1378 = vmatprep.subr.mxu1 %v1452_v0 }
 0x1d4   :  { %1359 = vmatpush3.msra.mxu0 %v1142_v56  ;;  %1379 = vmatpush3.msra.mxu1 %v773_v10 }
 0x1d5   :  { %1361 = vmatmul.mubr.msk.f32.vlgmr.msra.gmra.mxu0 %vm39_vm0, %v643_v59  ;;  %1401 = vmatprep.subr.mxu0 %v1452_v0  ;;  %v944_v59 = vld [vmem:[%s1852_s9] sm:$0xff] }
 0x1d6   :  { %1363 = vmatprep.mubr.msk.f32.mxu0 %vm39_vm0, %v646_v61  ;;  %1402 = vmatpush3.msra.mxu0 %v779_v63 }
 0x1d7   :  { %1403 = vmatprep.subr.mxu0 %v1452_v0  ;;  %1380 = vmatprep.subr.mxu1 %v1452_v0 }
 0x1d8   :  { %1404 = vmatpush3.msra.mxu0 %v778_v1  ;;  %1381 = vmatpush3.msra.mxu1 %v772_v11 }
 0x1d9   :  { %1364 = vmatmul.mubr.msk.f32.gmra.mxu0 %vm39_vm0, %v648_v62  ;;  %1405 = vmatprep.subr.mxu0 %v1452_v0 }
 0x1da   :  { %1433 = vmatprep.mubr.msk.f32.mxu0 %vm1453_vm1, %v1452_v0  ;;  %1406 = vmatpush3.msra.mxu0 %v777_v2 }
 0x1db   :  { %1407 = vmatprep.subr.mxu0 %v1452_v0  ;;  %1382 = vmatprep.subr.mxu1 %v1452_v0 }
 0x1dc   :  { %1408 = vmatpush3.msra.mxu0 %v776_v3  ;;  %1383 = vmatpush3.msra.mxu1 %v771_v12 }
 0x1dd   :  { %1409 = vmatprep.subr.mxu0 %v1452_v0  ;;  %1384 = vmatprep.subr.mxu1 %v1452_v0 }
 0x1de   :  { %1410 = vmatpush3.msra.mxu0 %v775_v8  ;;  %1385 = vmatpush3.msra.mxu1 %v770_v13 }
 0x1df   :  { %1411 = vmatprep.subr.mxu0 %v1452_v0  ;;  %1386 = vmatprep.subr.mxu1 %v1452_v0 }
 0x1e0   :  { %1412 = vmatpush3.msra.mxu0 %v774_v9  ;;  %1387 = vmatpush3.msra.mxu1 %v769_v14 }
 0x1e1   :  { %1413 = vmatprep.subr.mxu0 %v1452_v0  ;;  %1388 = vmatprep.subr.mxu1 %v1452_v0 }
 0x1e2   :  { %1414 = vmatpush3.msra.mxu0 %v773_v10  ;;  %1389 = vmatpush3.msra.mxu1 %v768_v15  ;;  %v937_v10 = vld [vmem:[%s1853_s4] sm:$0x1] }
 0x1e3   :  { %1415 = vmatprep.subr.mxu0 %v1452_v0  ;;  %1390 = vmatprep.subr.mxu1 %v1452_v0 }
 0x1e4   :  { %1416 = vmatpush3.msra.mxu0 %v772_v11  ;;  %1391 = vmatpush3.msra.mxu1 %v767_v16 }
 0x1e5   :  { %1417 = vmatprep.subr.mxu0 %v1452_v0  ;;  %1392 = vmatprep.subr.mxu1 %v1452_v0 }
 0x1e6   :  { %1418 = vmatpush3.msra.mxu0 %v771_v12  ;;  %1393 = vmatpush3.msra.mxu1 %v766_v17 }
 0x1e7   :  { %1419 = vmatprep.subr.mxu0 %v1452_v0  ;;  %1394 = vmatprep.subr.mxu1 %v1452_v0 }
 0x1e8   :  { %1420 = vmatpush3.msra.mxu0 %v770_v13  ;;  %1395 = vmatpush3.msra.mxu1 %v765_v18  ;;  %v941_v13 = vld [vmem:[%s1854_s5] sm:$0x1] }
 0x1e9   :  { %1421 = vmatprep.subr.mxu0 %v1452_v0  ;;  %1396 = vmatprep.subr.mxu1 %v1452_v0 }
 0x1ea   :  { %1422 = vmatpush3.msra.mxu0 %v769_v14  ;;  %1397 = vmatpush3.msra.mxu1 %v764_v20 }
 0x1eb   :  { %1423 = vmatprep.subr.mxu0 %v1452_v0  ;;  %1436 = vmatprep.subr.mxu1 %v1452_v0 }
 0x1ec   :  { %1424 = vmatpush3.msra.mxu0 %v768_v15 }
 0x1ed   :  { %1425 = vmatprep.subr.mxu0 %v1452_v0 }
 0x1ee   :  { %1426 = vmatpush3.msra.mxu0 %v767_v16 }
 0x1ef   :  { %1427 = vmatprep.subr.mxu0 %v1452_v0 }
 0x1f0   :  { %1428 = vmatpush3.msra.mxu0 %v766_v17 }
 0x1f1   :  { %1429 = vmatprep.subr.mxu0 %v1452_v0 }
 0x1f2   :  { %1430 = vmatpush3.msra.mxu0 %v765_v18 }
 0x1f3   :  { %1431 = vmatprep.subr.mxu0 %v1452_v0 }
 0x1f4   :  { %1432 = vmatpush3.msra.mxu0 %v764_v20 }
 0x282   :  { %v1340_v23 = vpop.f32.mrf.mxu1 }
 0x284   :  { %v619_v25 = vpop.f32.mrf.mxu1 }
 0x285   :  { %v1318_v21 = vpop.f32.mrf.mxu0 }
 0x286   :  { %v1343_v27 = vpop.f32.mrf.mxu1  ;;  %v625_v29 = vadd.f32 %v1340_v23, %v1318_v21 }
 0x287   :  { %v526_v22 = vpop.f32.mrf.mxu0 }
 0x288   :  { %v620_v30 = vadd.f32 %v619_v25, %v526_v22  ;;  %v629_v4 = vpop.f32.mrf.mxu1 }
 0x289   :  { %v1321_v24 = vpop.f32.mrf.mxu0 }
 0x28a   :  { %v635_v6 = vadd.f32 %v1343_v27, %v1321_v24 }
 0x28b   :  { %v536_v26 = vpop.f32.mrf.mxu0 }
 0x28c   :  { %v630_v34 = vadd.f32 %v629_v4, %v536_v26 }
 0x295   :  { %v1362_v28 = vpop.f32.mrf.mxu0 }
 0x296   :  { %v1805_v32 = vadd.f32 %v1362_v28, %v625_v29 }
 0x297   :  { %v732_v31 = vpop.f32.mrf.mxu0 }
 0x298   :  { %v1807_v33 = vadd.f32 %v732_v31, %v620_v30  ;;  %v852_v36 = vmul.f32 %v1805_v32, %v1805_v32 }
 0x299   :  { %v1365_v5 = vpop.f32.mrf.mxu0 }
 0x29a   :  { %v851_v7 = vmul.f32 %v1807_v33, %v1807_v33  ;;  %v755_v37 = vadd.f32 %v1805_v32, %v1807_v33  ;;  %v754_v38 = vadd.f32 %v1365_v5, %v635_v6 }
 0x29b   :  { %v742_v35 = vpop.f32.mrf.mxu0 }
 0x29c   :  { %v753_v39 = vadd.f32 %v742_v35, %v630_v34  ;;  %v855_v40 = vadd.f32 %v852_v36, %v851_v7  ;;  %v854_v43 = vmul.f32 %v754_v38, %v754_v38 }
 0x29e   :  { %v756_v41 = vadd.f32 %v755_v37, %v753_v39  ;;  %v853_v42 = vmul.f32 %v753_v39, %v753_v39 }
 0x2a0   :  { %v757_v44 = vadd.f32 %v756_v41, %v754_v38  ;;  %v856_v45 = vadd.f32 %v855_v40, %v853_v42 }
 0x2a2   :  { %v758_v46 = vrot.slane %v757_v44, 4  ;;  %v857_v47 = vadd.f32 %v856_v45, %v854_v43 }
 0x2a4   :  { %v759_v48 = vadd.f32 %v758_v46, %v757_v44  ;;  %v858_v49 = vrot.slane %v857_v47, 4 }
 0x2a6   :  { %v760_v50 = vrot.slane %v759_v48, 2  ;;  %v859_v51 = vadd.f32 %v858_v49, %v857_v47 }
 0x2a8   :  { %v761_v52 = vadd.f32 %v760_v50, %v759_v48  ;;  %v860_v53 = vrot.slane %v859_v51, 2 }
 0x2aa   :  { %v762_v54 = vrot.slane %v761_v52, 1  ;;  %v861_v55 = vadd.f32 %v860_v53, %v859_v51 }
 0x2ac   :  { %v763_v56 = vadd.f32 %v762_v54, %v761_v52  ;;  %v862_v57 = vrot.slane %v861_v55, 1 }
 0x2ae   :  { %1399 = vmatmul.mubr.f32.vlgmr.msra.gmra.mxu1 %v763_v56  ;;  %v863_v58 = vadd.f32 %v862_v57, %v861_v55 }
 0x2af   :  { %1438 = vmatprep.mubr.msk.f32.mxu1 %vm1453_vm1, %v1452_v0  ;;  %1437 = vmatpush3.msra.mxu1 %v944_v59 }
 0x2b0   :  { %1434 = vmatmul.mubr.f32.vlgmr.msra.gmra.mxu0 %v863_v58  ;;  %1441 = vmatprep.subr.mxu1 %v1452_v0 }
 0x36e   :  { %v846_v60 = vpop.f32.mrf.mxu1 }
 0x36f   :  { %v850_v61 = vmul.f32 0.001953125, %v846_v60 }
 0x370   :  { %v1400_v62 = vpop.f32.mrf.mxu1  ;;  %v930_v63 = vpop.f32.mrf.mxu0 }
 0x371   :  { %v935_v1 = vmul.f32 %v850_v61, %v850_v61  ;;  %v934_v2 = vmul.f32 0.001953125, %v930_v63 }
 0x372   :  { %v1435_v3 = vpop.f32.mrf.mxu0 }
 0x373   :  { %v936_v8 = vsub.f32 %v934_v2, %v935_v1 }
 0x375   :  { %v938_v9 = vadd.f32 1e-05, %v936_v8 }
 0x377   :  { %1450 = vrsqrt.f32 %v938_v9 }
 0x384   :  { %v1451_v11 = vpop.eup %1450 }
 0x385   :  { %v940_v12 = vmul.f32 %v1451_v11, %v937_v10 }
 0x387   :  { %1439 = vmatmul.mubr.msk.f32.vlgmr.msra.gmra.mxu1 %vm945_vm7, %v940_v12  ;;  %v942_v14 = vmul.f32 %v940_v12, %v850_v61 }
 0x388   :  { %1442 = vmatpush3.msra.mxu1 %v944_v59  ;;  %1443 = vmatprep.mubr.msk.f32.mxu1 %vm1453_vm1, %v1452_v0 }
 0x389   :  { %v943_v15 = vsub.f32 %v941_v13, %v942_v14 }
 0x38b   :  { %1444 = vmatmul.mubr.msk.f32.vlgmr.msra.gmra.mxu1 %vm945_vm7, %v943_v15 }
 0x447   :  { %v1015_v16 = vpop.f32.mrf.mxu1 }
 0x448   :  { %v1095_v17 = vrot.slane %v1015_v16, %v1668_v19 }
 0x449   :  { %v1440_v18 = vpop.f32.mrf.mxu1 }
 0x44a   :  { %v1096_v20 = vmul.f32 %v1095_v17, %v1807_v33  ;;  %v1097_v22 = vmul.f32 %v1095_v17, %v1805_v32  ;;  %v1098_v23 = vmul.f32 %v1095_v17, %v753_v39  ;;  %v1099_v24 = vmul.f32 %v1095_v17, %v754_v38 }
 0x44b   :  { %v1088_v21 = vpop.f32.mrf.mxu1 }
 0x44c   :  { %v1103_v25 = vrot.slane %v1088_v21, %v1668_v19 }
 0x44d   :  { %v1445_v26 = vpop.f32.mrf.mxu1 }
 0x44e   :  { %v1104_v27 = vadd.f32 %v1103_v25, %v1096_v20  ;;  %v1105_v28 = vadd.f32 %v1103_v25, %v1097_v22  ;;  %v1106_v29 = vadd.f32 %v1103_v25, %v1098_v23  ;;  %v1107_v0 = vadd.f32 %v1103_v25, %v1099_v24 }
 0x450   :  { %v1108_v30 = vmax.f32 %v1104_v27, 0.0  ;;  %v1109_v31 = vmax.f32 %v1105_v28, 0.0  ;;  %v1110_v4 = vmax.f32 %v1106_v29, 0.0  ;;  %v1111_v5 = vmax.f32 %v1107_v0, 0.0 }
 0x452   :  { %1112 = vst [vmem:[%s1855_s10] sm:$0xff] %v1108_v30  ;;  %1113 = vst [vmem:[%s1855_s10 + $0x8] sm:$0xff] %v1109_v31 }
 0x453   :  { %1114 = vst [vmem:[%s1855_s10 + $0x10] sm:$0xff] %v1110_v4  ;;  %1115 = vst [vmem:[%s1855_s10 + $0x18] sm:$0xff] %v1111_v5 }

</bundles_post_ra>
